<compile_context>
chip_gen: v5e
topology: v5e:2x2
jax: 0.10.0
libtpu: 0.0.40
codegen_flags: <defaults>
</compile_context>

<pallas_src>
import numpy as np
import jax
import jax.numpy as jnp
from jax.experimental import pallas as pl
from jax.experimental.pallas import tpu as pltpu

LANE = 128


def _round_up(x, m):
    return ((x + m - 1) // m) * m


def gru_kernel(tok_ref, h0_ref, ew_ref, whh_ref, bx_ref, bh_ref, wfc_ref,
               bfc_ref, logits_ref, hn_ref, gx_ref):
    """Whole CharGRU forward in one kernel invocation.

    tok_ref : (S*B, 1)   int32  time-major flattened token ids (row t*B+b = tok[b,t])
    h0_ref  : (B, Hp)    f32    initial hidden, zero-padded lanes
    ew_ref  : (Vp, 3*Hp) bf16   E @ [W_ir | W_iz | W_in]  (pre-composed, lane-padded)
    whh_ref : (Hp, 3*Hp) bf16   [W_hr | W_hz | W_hn]
    bx_ref  : (1, 3*Hp)  f32    [b_ir+b_hr | b_iz+b_hz | b_in]
    bh_ref  : (1, 3*Hp)  f32    [0 | 0 | b_hn]
    wfc_ref : (Hp, Op)   bf16   fc weight (h @ W layout)
    bfc_ref : (1, Op)    f32    fc bias
    outputs : logits_ref (B, Op) f32, hn_ref (B, Hp) f32
    scratch : gx_ref (S*B, 3*Hp) f32  -- input-path gates for ALL timesteps
    """
    B, Hp = h0_ref.shape
    SB = tok_ref.shape[0]
    S = SB // B
    Vp = ew_ref.shape[0]

    # ---- input path for ALL timesteps in one matmul (off the serial chain) ----
    toks = tok_ref[...]                                          # (S*B, 1) int32
    lane_ids = jax.lax.broadcasted_iota(jnp.int32, (SB, Vp), 1)
    # Token ids are < V <= Vp by construction; ids in [V, Vp) would hit zero
    # embedding rows (harmless), ids >= Vp would produce an all-zero one-hot.
    onehot = jnp.where(lane_ids == toks, 1.0, 0.0).astype(jnp.bfloat16)
    gx_ref[...] = (
        jnp.dot(onehot, ew_ref[...], preferred_element_type=jnp.float32)
        + bx_ref[...])

    bh = bh_ref[...]
    h = h0_ref[...]                                              # (B, Hp) f32
    for t in range(S):  # S static & tiny -> fully unrolled, no grid overhead
        gx_t = gx_ref[pl.ds(t * B, B), :]                        # (B, 3*Hp) f32
        # W_hh read from VMEM inside the loop (no 48-vreg SSA value held live
        # across the unrolled iterations).
        gh = jnp.dot(h.astype(jnp.bfloat16), whh_ref[...],
                     preferred_element_type=jnp.float32) + bh
        # Fused sigmoid over the contiguous 256-lane [r | z] slice.
        rz = jax.nn.sigmoid(gx_t[:, :2 * Hp] + gh[:, :2 * Hp])
        r = rz[:, :Hp]
        z = rz[:, Hp:]
        n = jnp.tanh(gx_t[:, 2 * Hp:] + r * gh[:, 2 * Hp:])
        h = (1.0 - z) * n + z * h                                # PyTorch GRU update
        # Padded-lane invariant: padded weight columns/rows, padded biases and
        # the padded lanes of h0 are all exactly zero, so for padded lanes
        # r=z=0.5, n=0 and h_pad_new = 0.5 * h_pad = 0 forever.

    hn_ref[...] = h                                              # written once
    logits_ref[...] = (
        jnp.dot(h.astype(jnp.bfloat16), wfc_ref[...],
                preferred_element_type=jnp.float32) + bfc_ref[...])


def pack_params(params):
    """Pad / stack / pre-compose the weights into the lane-dense kernel layout.

    Matmul operands (ew, whh, wfc) are stored in bf16; the compose/pad math is
    done in f32 first.  All padded lanes are exactly zero (exact zeros survive
    the bf16 cast), which the kernel relies on to keep padded hidden lanes zero.
    """
    emb = params["embedding"].astype(jnp.float32)          # (V, H)
    wi = params["w_ih"].astype(jnp.float32)                # (3, H, H); x @ wi[g]
    wh = params["w_hh"].astype(jnp.float32)                # (3, H, H); h @ wh[g]
    bi = params["b_ih"].astype(jnp.float32)                # (3, 1, H)
    bh = params["b_hh"].astype(jnp.float32)                # (3, 1, H)
    wf = params["w_fc"].astype(jnp.float32)                # (H, O)
    bf = params["b_fc"].astype(jnp.float32)                # (1, O)

    V, H = emb.shape
    O = wf.shape[1]
    Hp = _round_up(H, LANE)
    Vp = _round_up(V, LANE)
    Op = _round_up(O, LANE)
    Gp = 3 * Hp

    wih_all = jnp.zeros((H, Gp), jnp.float32)
    whh_all = jnp.zeros((Hp, Gp), jnp.float32)
    bias_x = jnp.zeros((1, Gp), jnp.float32)
    bias_h = jnp.zeros((1, Gp), jnp.float32)
    for g in range(3):                                     # gate g -> 128-lane slot g
        lo = g * Hp
        wih_all = wih_all.at[:, lo:lo + H].set(wi[g])
        whh_all = whh_all.at[:H, lo:lo + H].set(wh[g])
    # r, z gates: fold b_hh into the x-side bias; n keeps b_hh separate because
    # of the r * (h @ W_hn + b_hn) term.
    bias_x = bias_x.at[:, 0 * Hp:0 * Hp + H].set(bi[0] + bh[0])
    bias_x = bias_x.at[:, 1 * Hp:1 * Hp + H].set(bi[1] + bh[1])
    bias_x = bias_x.at[:, 2 * Hp:2 * Hp + H].set(bi[2])
    bias_h = bias_h.at[:, 2 * Hp:2 * Hp + H].set(bh[2])

    # Compose embedding with the stacked input projection:
    #   x_t @ [W_ir|W_iz|W_in] == onehot(tok_t) @ (E @ [W_ir|W_iz|W_in])
    emb_wih = jnp.zeros((Vp, Gp), jnp.float32).at[:V, :].set(emb @ wih_all)

    wfc_pad = jnp.zeros((Hp, Op), jnp.float32).at[:H, :O].set(wf)
    bfc_pad = jnp.zeros((1, Op), jnp.float32).at[:, :O].set(bf)

    return {
        "emb_wih": emb_wih.astype(jnp.bfloat16),
        "whh_all": whh_all.astype(jnp.bfloat16),
        "bias_x": bias_x, "bias_h": bias_h,
        "wfc": wfc_pad.astype(jnp.bfloat16), "bfc": bfc_pad,
        "H": H, "O": O, "Hp": Hp, "Vp": Vp, "Op": Op, "Gp": Gp,
    }


def char_gru_forward(tokens, h0, packed):
    """tokens (B, S) int32, h0 (1, B, H) f32 -> (logits (B, O), hidden (1, B, H))."""
    B, S = tokens.shape
    H, O = packed["H"], packed["O"]
    Hp, Op, Gp = packed["Hp"], packed["Op"], packed["Gp"]

    # Time-major flatten: row t*B + b holds tokens[b, t].
    tok_col = jnp.transpose(tokens.astype(jnp.int32)).reshape(S * B, 1)
    h0_pad = jnp.zeros((B, Hp), jnp.float32).at[:, :H].set(h0[0])

    def vspec():
        return pl.BlockSpec(memory_space=pltpu.MemorySpace.VMEM)

    logits_pad, hn_pad = pl.pallas_call(
        gru_kernel,
        out_shape=(
            jax.ShapeDtypeStruct((B, Op), jnp.float32),
            jax.ShapeDtypeStruct((B, Hp), jnp.float32),
        ),
        in_specs=[vspec() for _ in range(8)],          # full arrays, resident in VMEM
        out_specs=(vspec(), vspec()),
        scratch_shapes=[pltpu.VMEM((S * B, Gp), jnp.float32)],   # gx for all steps
    )(tok_col, h0_pad, packed["emb_wih"], packed["whh_all"],
      packed["bias_x"], packed["bias_h"], packed["wfc"], packed["bfc"])

    # Slice the lane padding back off (logits -> (B, O), hidden -> (1, B, H)).
    return logits_pad[:, :O], hn_pad[None, :, :H]


def ref_forward(tokens, h0, params):
    """Pure-JAX f32 reference with identical math, for correctness checking."""
    emb = params["embedding"][tokens]                      # (B, S, H)
    wi, wh = params["w_ih"], params["w_hh"]
    bi, bh = params["b_ih"], params["b_hh"]
    h = h0[0]
    for t in range(emb.shape[1]):
        x_t = emb[:, t, :]
        r = jax.nn.sigmoid(x_t @ wi[0] + bi[0] + h @ wh[0] + bh[0])
        z = jax.nn.sigmoid(x_t @ wi[1] + bi[1] + h @ wh[1] + bh[1])
        n = jnp.tanh(x_t @ wi[2] + bi[2] + r * (h @ wh[2] + bh[2]))
        h = (1.0 - z) * n + z * h
    logits = h @ params["w_fc"] + params["b_fc"]
    return logits, h[None]


def init_params(key, vocab, hidden, out):
    ks = jax.random.split(key, 7)
    s = 0.1
    return {
        "embedding": jax.random.normal(ks[0], (vocab, hidden), jnp.float32) * s,
        # gate order (r, z, n); already transposed so the forward does x @ W
        "w_ih": jax.random.normal(ks[1], (3, hidden, hidden), jnp.float32) * s,
        "w_hh": jax.random.normal(ks[2], (3, hidden, hidden), jnp.float32) * s,
        "b_ih": jax.random.normal(ks[3], (3, 1, hidden), jnp.float32) * s,
        "b_hh": jax.random.normal(ks[4], (3, 1, hidden), jnp.float32) * s,
        "w_fc": jax.random.normal(ks[5], (hidden, out), jnp.float32) * s,
        "b_fc": jax.random.normal(ks[6], (1, out), jnp.float32) * s,
    }


if __name__ == "__main__":
    # Small shapes consistent with the module: (batch, seq) int token ids,
    # vocab = len(chars) ~ 65, small hidden for the demo.
    B, S, H, V = 8, 8, 32, 65
    O = V

    key = jax.random.PRNGKey(0)
    k_tok, k_par = jax.random.split(key)
    tokens = jax.random.randint(k_tok, (B, S), 0, V, dtype=jnp.int32)
    hidden0 = jnp.zeros((1, B, H), jnp.float32)            # init_hidden(batch)
    params = init_params(k_par, V, H, O)
    packed = pack_params(params)                           # one-time weight prep

    logits, h_n = char_gru_forward(tokens, hidden0, packed)
    logits = jax.block_until_ready(logits)
    h_n = jax.block_until_ready(h_n)

    ref_logits, ref_h = ref_forward(tokens, hidden0, params)
    assert logits.shape == (B, O) and h_n.shape == (1, B, H)
    # Kernel runs matmuls with bf16 operands / f32 accumulation, so tolerance
    # vs. the pure-f32 reference is loosened accordingly.
    np.testing.assert_allclose(np.asarray(logits), np.asarray(ref_logits),
                               rtol=2e-2, atol=2e-2)
    np.testing.assert_allclose(np.asarray(h_n), np.asarray(ref_h),
                               rtol=2e-2, atol=2e-2)
    print("KERNEL_OK")
</pallas_src>

<mosaic_0001>
module attributes {stable_mosaic.version = 11 : i64} {
  func.func @gru_kernel(%arg0: memref<64x1xi32, #tpu.memory_space<vmem>>, %arg1: memref<8x128xf32, #tpu.memory_space<vmem>>, %arg2: memref<128x384xbf16, #tpu.memory_space<vmem>>, %arg3: memref<128x384xbf16, #tpu.memory_space<vmem>>, %arg4: memref<1x384xf32, #tpu.memory_space<vmem>>, %arg5: memref<1x384xf32, #tpu.memory_space<vmem>>, %arg6: memref<128x128xbf16, #tpu.memory_space<vmem>>, %arg7: memref<1x128xf32, #tpu.memory_space<vmem>>, %arg8: memref<8x128xf32, #tpu.memory_space<vmem>>, %arg9: memref<8x128xf32, #tpu.memory_space<vmem>>, %arg10: memref<64x384xf32, #tpu.memory_space<vmem>>) attributes {dimension_semantics = [], scalar_prefetch = 0 : i64, scratch_operands = 1 : i64, tpu.core_type = #tpu.core_type<tc>} {
    %c0 = arith.constant 0 : index
    %c0_0 = arith.constant 0 : index
    %0 = vector.load %arg0[%c0, %c0_0] : memref<64x1xi32, #tpu.memory_space<vmem>>, vector<64x1xi32>
    %1 = tpu.iota {dimensions = array<i32: 1>} : vector<64x128xi32>
    %2 = vector.broadcast %0 : vector<64x1xi32> to vector<64x128xi32>
    %3 = arith.cmpi eq, %1, %2 : vector<64x128xi32>
    %cst = arith.constant 1.000000e+00 : f32
    %cst_1 = arith.constant 0.000000e+00 : f32
    %4 = vector.broadcast %cst : f32 to vector<64x128xf32>
    %5 = vector.broadcast %cst_1 : f32 to vector<64x128xf32>
    %6 = arith.select %3, %4, %5 : vector<64x128xi1>, vector<64x128xf32>
    %7 = arith.truncf %6 : vector<64x128xf32> to vector<64x128xbf16>
    %c0_2 = arith.constant 0 : index
    %c0_3 = arith.constant 0 : index
    %8 = vector.load %arg2[%c0_2, %c0_3] : memref<128x384xbf16, #tpu.memory_space<vmem>>, vector<128x384xbf16>
    %cst_4 = arith.constant dense<0.000000e+00> : vector<64x384xf32>
    %9 = tpu.matmul %7, %8, %cst_4 {dimension_numbers = #tpu.dot_dimension_numbers<[1], [0], [0], [1], [0, 0, 1, 1], [], []>} : vector<64x128xbf16>, vector<128x384xbf16>, vector<64x384xf32> -> vector<64x384xf32>
    %c0_5 = arith.constant 0 : index
    %c0_6 = arith.constant 0 : index
    %10 = vector.load %arg4[%c0_5, %c0_6] : memref<1x384xf32, #tpu.memory_space<vmem>>, vector<1x384xf32>
    %11 = vector.broadcast %10 : vector<1x384xf32> to vector<64x384xf32>
    %12 = arith.addf %9, %11 : vector<64x384xf32>
    %c0_7 = arith.constant 0 : index
    %c0_8 = arith.constant 0 : index
    %13 = vector.load %arg10[%c0_7, %c0_8] : memref<64x384xf32, #tpu.memory_space<vmem>>, vector<64x384xf32>
    tpu.vector_store %arg10[%c0_7, %c0_8], %12 {strides = array<i32>} : memref<64x384xf32, #tpu.memory_space<vmem>>, vector<64x384xf32>,
    %c0_9 = arith.constant 0 : index
    %c0_10 = arith.constant 0 : index
    %14 = vector.load %arg5[%c0_9, %c0_10] : memref<1x384xf32, #tpu.memory_space<vmem>>, vector<1x384xf32>
    %c0_11 = arith.constant 0 : index
    %c0_12 = arith.constant 0 : index
    %15 = vector.load %arg1[%c0_11, %c0_12] : memref<8x128xf32, #tpu.memory_space<vmem>>, vector<8x128xf32>
    %c0_13 = arith.constant 0 : index
    %c0_14 = arith.constant 0 : index
    %16 = vector.load %arg10[%c0_13, %c0_14] : memref<64x384xf32, #tpu.memory_space<vmem>>, vector<8x384xf32>
    %17 = arith.truncf %15 : vector<8x128xf32> to vector<8x128xbf16>
    %c0_15 = arith.constant 0 : index
    %c0_16 = arith.constant 0 : index
    %18 = vector.load %arg3[%c0_15, %c0_16] : memref<128x384xbf16, #tpu.memory_space<vmem>>, vector<128x384xbf16>
    %cst_17 = arith.constant dense<0.000000e+00> : vector<8x384xf32>
    %19 = tpu.matmul %17, %18, %cst_17 {dimension_numbers = #tpu.dot_dimension_numbers<[1], [0], [0], [1], [0, 0, 1, 1], [], []>} : vector<8x128xbf16>, vector<128x384xbf16>, vector<8x384xf32> -> vector<8x384xf32>
    %20 = vector.broadcast %14 : vector<1x384xf32> to vector<8x384xf32>
    %21 = arith.addf %19, %20 : vector<8x384xf32>
    %22 = vector.extract_strided_slice %16 {offsets = [0, 0], sizes = [8, 256], strides = [1, 1]} : vector<8x384xf32> to vector<8x256xf32>
    %23 = vector.extract_strided_slice %21 {offsets = [0, 0], sizes = [8, 256], strides = [1, 1]} : vector<8x384xf32> to vector<8x256xf32>
    %24 = arith.addf %22, %23 : vector<8x256xf32>
    %25 = arith.negf %24 : vector<8x256xf32>
    %26 = math.exp %25 : vector<8x256xf32>
    %cst_18 = arith.constant 1.000000e+00 : f32
    %27 = vector.broadcast %cst_18 : f32 to vector<8x256xf32>
    %28 = arith.addf %27, %26 : vector<8x256xf32>
    %29 = arith.divf %27, %28 : vector<8x256xf32>
    %30 = vector.extract_strided_slice %29 {offsets = [0, 0], sizes = [8, 128], strides = [1, 1]} : vector<8x256xf32> to vector<8x128xf32>
    %31 = vector.extract_strided_slice %29 {offsets = [0, 128], sizes = [8, 128], strides = [1, 1]} : vector<8x256xf32> to vector<8x128xf32>
    %32 = vector.extract_strided_slice %16 {offsets = [0, 256], sizes = [8, 128], strides = [1, 1]} : vector<8x384xf32> to vector<8x128xf32>
    %33 = vector.extract_strided_slice %21 {offsets = [0, 256], sizes = [8, 128], strides = [1, 1]} : vector<8x384xf32> to vector<8x128xf32>
    %34 = arith.mulf %30, %33 : vector<8x128xf32>
    %35 = arith.addf %32, %34 : vector<8x128xf32>
    %36 = math.tanh %35 : vector<8x128xf32>
    %cst_19 = arith.constant 1.000000e+00 : f32
    %37 = vector.broadcast %cst_19 : f32 to vector<8x128xf32>
    %38 = arith.subf %37, %31 : vector<8x128xf32>
    %39 = arith.mulf %38, %36 : vector<8x128xf32>
    %40 = arith.mulf %31, %15 : vector<8x128xf32>
    %41 = arith.addf %39, %40 : vector<8x128xf32>
    %c8 = arith.constant 8 : index
    %c0_20 = arith.constant 0 : index
    %42 = vector.load %arg10[%c8, %c0_20] : memref<64x384xf32, #tpu.memory_space<vmem>>, vector<8x384xf32>
    %43 = arith.truncf %41 : vector<8x128xf32> to vector<8x128xbf16>
    %c0_21 = arith.constant 0 : index
    %c0_22 = arith.constant 0 : index
    %44 = vector.load %arg3[%c0_21, %c0_22] : memref<128x384xbf16, #tpu.memory_space<vmem>>, vector<128x384xbf16>
    %cst_23 = arith.constant dense<0.000000e+00> : vector<8x384xf32>
    %45 = tpu.matmul %43, %44, %cst_23 {dimension_numbers = #tpu.dot_dimension_numbers<[1], [0], [0], [1], [0, 0, 1, 1], [], []>} : vector<8x128xbf16>, vector<128x384xbf16>, vector<8x384xf32> -> vector<8x384xf32>
    %46 = vector.broadcast %14 : vector<1x384xf32> to vector<8x384xf32>
    %47 = arith.addf %45, %46 : vector<8x384xf32>
    %48 = vector.extract_strided_slice %42 {offsets = [0, 0], sizes = [8, 256], strides = [1, 1]} : vector<8x384xf32> to vector<8x256xf32>
    %49 = vector.extract_strided_slice %47 {offsets = [0, 0], sizes = [8, 256], strides = [1, 1]} : vector<8x384xf32> to vector<8x256xf32>
    %50 = arith.addf %48, %49 : vector<8x256xf32>
    %51 = arith.negf %50 : vector<8x256xf32>
    %52 = math.exp %51 : vector<8x256xf32>
    %cst_24 = arith.constant 1.000000e+00 : f32
    %53 = vector.broadcast %cst_24 : f32 to vector<8x256xf32>
    %54 = arith.addf %53, %52 : vector<8x256xf32>
    %55 = arith.divf %53, %54 : vector<8x256xf32>
    %56 = vector.extract_strided_slice %55 {offsets = [0, 0], sizes = [8, 128], strides = [1, 1]} : vector<8x256xf32> to vector<8x128xf32>
    %57 = vector.extract_strided_slice %55 {offsets = [0, 128], sizes = [8, 128], strides = [1, 1]} : vector<8x256xf32> to vector<8x128xf32>
    %58 = vector.extract_strided_slice %42 {offsets = [0, 256], sizes = [8, 128], strides = [1, 1]} : vector<8x384xf32> to vector<8x128xf32>
    %59 = vector.extract_strided_slice %47 {offsets = [0, 256], sizes = [8, 128], strides = [1, 1]} : vector<8x384xf32> to vector<8x128xf32>
    %60 = arith.mulf %56, %59 : vector<8x128xf32>
    %61 = arith.addf %58, %60 : vector<8x128xf32>
    %62 = math.tanh %61 : vector<8x128xf32>
    %cst_25 = arith.constant 1.000000e+00 : f32
    %63 = vector.broadcast %cst_25 : f32 to vector<8x128xf32>
    %64 = arith.subf %63, %57 : vector<8x128xf32>
    %65 = arith.mulf %64, %62 : vector<8x128xf32>
    %66 = arith.mulf %57, %41 : vector<8x128xf32>
    %67 = arith.addf %65, %66 : vector<8x128xf32>
    %c16 = arith.constant 16 : index
    %c0_26 = arith.constant 0 : index
    %68 = vector.load %arg10[%c16, %c0_26] : memref<64x384xf32, #tpu.memory_space<vmem>>, vector<8x384xf32>
    %69 = arith.truncf %67 : vector<8x128xf32> to vector<8x128xbf16>
    %c0_27 = arith.constant 0 : index
    %c0_28 = arith.constant 0 : index
    %70 = vector.load %arg3[%c0_27, %c0_28] : memref<128x384xbf16, #tpu.memory_space<vmem>>, vector<128x384xbf16>
    %cst_29 = arith.constant dense<0.000000e+00> : vector<8x384xf32>
    %71 = tpu.matmul %69, %70, %cst_29 {dimension_numbers = #tpu.dot_dimension_numbers<[1], [0], [0], [1], [0, 0, 1, 1], [], []>} : vector<8x128xbf16>, vector<128x384xbf16>, vector<8x384xf32> -> vector<8x384xf32>
    %72 = vector.broadcast %14 : vector<1x384xf32> to vector<8x384xf32>
    %73 = arith.addf %71, %72 : vector<8x384xf32>
    %74 = vector.extract_strided_slice %68 {offsets = [0, 0], sizes = [8, 256], strides = [1, 1]} : vector<8x384xf32> to vector<8x256xf32>
    %75 = vector.extract_strided_slice %73 {offsets = [0, 0], sizes = [8, 256], strides = [1, 1]} : vector<8x384xf32> to vector<8x256xf32>
    %76 = arith.addf %74, %75 : vector<8x256xf32>
    %77 = arith.negf %76 : vector<8x256xf32>
    %78 = math.exp %77 : vector<8x256xf32>
    %cst_30 = arith.constant 1.000000e+00 : f32
    %79 = vector.broadcast %cst_30 : f32 to vector<8x256xf32>
    %80 = arith.addf %79, %78 : vector<8x256xf32>
    %81 = arith.divf %79, %80 : vector<8x256xf32>
    %82 = vector.extract_strided_slice %81 {offsets = [0, 0], sizes = [8, 128], strides = [1, 1]} : vector<8x256xf32> to vector<8x128xf32>
    %83 = vector.extract_strided_slice %81 {offsets = [0, 128], sizes = [8, 128], strides = [1, 1]} : vector<8x256xf32> to vector<8x128xf32>
    %84 = vector.extract_strided_slice %68 {offsets = [0, 256], sizes = [8, 128], strides = [1, 1]} : vector<8x384xf32> to vector<8x128xf32>
    %85 = vector.extract_strided_slice %73 {offsets = [0, 256], sizes = [8, 128], strides = [1, 1]} : vector<8x384xf32> to vector<8x128xf32>
    %86 = arith.mulf %82, %85 : vector<8x128xf32>
    %87 = arith.addf %84, %86 : vector<8x128xf32>
    %88 = math.tanh %87 : vector<8x128xf32>
    %cst_31 = arith.constant 1.000000e+00 : f32
    %89 = vector.broadcast %cst_31 : f32 to vector<8x128xf32>
    %90 = arith.subf %89, %83 : vector<8x128xf32>
    %91 = arith.mulf %90, %88 : vector<8x128xf32>
    %92 = arith.mulf %83, %67 : vector<8x128xf32>
    %93 = arith.addf %91, %92 : vector<8x128xf32>
    %c24 = arith.constant 24 : index
    %c0_32 = arith.constant 0 : index
    %94 = vector.load %arg10[%c24, %c0_32] : memref<64x384xf32, #tpu.memory_space<vmem>>, vector<8x384xf32>
    %95 = arith.truncf %93 : vector<8x128xf32> to vector<8x128xbf16>
    %c0_33 = arith.constant 0 : index
    %c0_34 = arith.constant 0 : index
    %96 = vector.load %arg3[%c0_33, %c0_34] : memref<128x384xbf16, #tpu.memory_space<vmem>>, vector<128x384xbf16>
    %cst_35 = arith.constant dense<0.000000e+00> : vector<8x384xf32>
    %97 = tpu.matmul %95, %96, %cst_35 {dimension_numbers = #tpu.dot_dimension_numbers<[1], [0], [0], [1], [0, 0, 1, 1], [], []>} : vector<8x128xbf16>, vector<128x384xbf16>, vector<8x384xf32> -> vector<8x384xf32>
    %98 = vector.broadcast %14 : vector<1x384xf32> to vector<8x384xf32>
    %99 = arith.addf %97, %98 : vector<8x384xf32>
    %100 = vector.extract_strided_slice %94 {offsets = [0, 0], sizes = [8, 256], strides = [1, 1]} : vector<8x384xf32> to vector<8x256xf32>
    %101 = vector.extract_strided_slice %99 {offsets = [0, 0], sizes = [8, 256], strides = [1, 1]} : vector<8x384xf32> to vector<8x256xf32>
    %102 = arith.addf %100, %101 : vector<8x256xf32>
    %103 = arith.negf %102 : vector<8x256xf32>
    %104 = math.exp %103 : vector<8x256xf32>
    %cst_36 = arith.constant 1.000000e+00 : f32
    %105 = vector.broadcast %cst_36 : f32 to vector<8x256xf32>
    %106 = arith.addf %105, %104 : vector<8x256xf32>
    %107 = arith.divf %105, %106 : vector<8x256xf32>
    %108 = vector.extract_strided_slice %107 {offsets = [0, 0], sizes = [8, 128], strides = [1, 1]} : vector<8x256xf32> to vector<8x128xf32>
    %109 = vector.extract_strided_slice %107 {offsets = [0, 128], sizes = [8, 128], strides = [1, 1]} : vector<8x256xf32> to vector<8x128xf32>
    %110 = vector.extract_strided_slice %94 {offsets = [0, 256], sizes = [8, 128], strides = [1, 1]} : vector<8x384xf32> to vector<8x128xf32>
    %111 = vector.extract_strided_slice %99 {offsets = [0, 256], sizes = [8, 128], strides = [1, 1]} : vector<8x384xf32> to vector<8x128xf32>
    %112 = arith.mulf %108, %111 : vector<8x128xf32>
    %113 = arith.addf %110, %112 : vector<8x128xf32>
    %114 = math.tanh %113 : vector<8x128xf32>
    %cst_37 = arith.constant 1.000000e+00 : f32
    %115 = vector.broadcast %cst_37 : f32 to vector<8x128xf32>
    %116 = arith.subf %115, %109 : vector<8x128xf32>
    %117 = arith.mulf %116, %114 : vector<8x128xf32>
    %118 = arith.mulf %109, %93 : vector<8x128xf32>
    %119 = arith.addf %117, %118 : vector<8x128xf32>
    %c32 = arith.constant 32 : index
    %c0_38 = arith.constant 0 : index
    %120 = vector.load %arg10[%c32, %c0_38] : memref<64x384xf32, #tpu.memory_space<vmem>>, vector<8x384xf32>
    %121 = arith.truncf %119 : vector<8x128xf32> to vector<8x128xbf16>
    %c0_39 = arith.constant 0 : index
    %c0_40 = arith.constant 0 : index
    %122 = vector.load %arg3[%c0_39, %c0_40] : memref<128x384xbf16, #tpu.memory_space<vmem>>, vector<128x384xbf16>
    %cst_41 = arith.constant dense<0.000000e+00> : vector<8x384xf32>
    %123 = tpu.matmul %121, %122, %cst_41 {dimension_numbers = #tpu.dot_dimension_numbers<[1], [0], [0], [1], [0, 0, 1, 1], [], []>} : vector<8x128xbf16>, vector<128x384xbf16>, vector<8x384xf32> -> vector<8x384xf32>
    %124 = vector.broadcast %14 : vector<1x384xf32> to vector<8x384xf32>
    %125 = arith.addf %123, %124 : vector<8x384xf32>
    %126 = vector.extract_strided_slice %120 {offsets = [0, 0], sizes = [8, 256], strides = [1, 1]} : vector<8x384xf32> to vector<8x256xf32>
    %127 = vector.extract_strided_slice %125 {offsets = [0, 0], sizes = [8, 256], strides = [1, 1]} : vector<8x384xf32> to vector<8x256xf32>
    %128 = arith.addf %126, %127 : vector<8x256xf32>
    %129 = arith.negf %128 : vector<8x256xf32>
    %130 = math.exp %129 : vector<8x256xf32>
    %cst_42 = arith.constant 1.000000e+00 : f32
    %131 = vector.broadcast %cst_42 : f32 to vector<8x256xf32>
    %132 = arith.addf %131, %130 : vector<8x256xf32>
    %133 = arith.divf %131, %132 : vector<8x256xf32>
    %134 = vector.extract_strided_slice %133 {offsets = [0, 0], sizes = [8, 128], strides = [1, 1]} : vector<8x256xf32> to vector<8x128xf32>
    %135 = vector.extract_strided_slice %133 {offsets = [0, 128], sizes = [8, 128], strides = [1, 1]} : vector<8x256xf32> to vector<8x128xf32>
    %136 = vector.extract_strided_slice %120 {offsets = [0, 256], sizes = [8, 128], strides = [1, 1]} : vector<8x384xf32> to vector<8x128xf32>
    %137 = vector.extract_strided_slice %125 {offsets = [0, 256], sizes = [8, 128], strides = [1, 1]} : vector<8x384xf32> to vector<8x128xf32>
    %138 = arith.mulf %134, %137 : vector<8x128xf32>
    %139 = arith.addf %136, %138 : vector<8x128xf32>
    %140 = math.tanh %139 : vector<8x128xf32>
    %cst_43 = arith.constant 1.000000e+00 : f32
    %141 = vector.broadcast %cst_43 : f32 to vector<8x128xf32>
    %142 = arith.subf %141, %135 : vector<8x128xf32>
    %143 = arith.mulf %142, %140 : vector<8x128xf32>
    %144 = arith.mulf %135, %119 : vector<8x128xf32>
    %145 = arith.addf %143, %144 : vector<8x128xf32>
    %c40 = arith.constant 40 : index
    %c0_44 = arith.constant 0 : index
    %146 = vector.load %arg10[%c40, %c0_44] : memref<64x384xf32, #tpu.memory_space<vmem>>, vector<8x384xf32>
    %147 = arith.truncf %145 : vector<8x128xf32> to vector<8x128xbf16>
    %c0_45 = arith.constant 0 : index
    %c0_46 = arith.constant 0 : index
    %148 = vector.load %arg3[%c0_45, %c0_46] : memref<128x384xbf16, #tpu.memory_space<vmem>>, vector<128x384xbf16>
    %cst_47 = arith.constant dense<0.000000e+00> : vector<8x384xf32>
    %149 = tpu.matmul %147, %148, %cst_47 {dimension_numbers = #tpu.dot_dimension_numbers<[1], [0], [0], [1], [0, 0, 1, 1], [], []>} : vector<8x128xbf16>, vector<128x384xbf16>, vector<8x384xf32> -> vector<8x384xf32>
    %150 = vector.broadcast %14 : vector<1x384xf32> to vector<8x384xf32>
    %151 = arith.addf %149, %150 : vector<8x384xf32>
    %152 = vector.extract_strided_slice %146 {offsets = [0, 0], sizes = [8, 256], strides = [1, 1]} : vector<8x384xf32> to vector<8x256xf32>
    %153 = vector.extract_strided_slice %151 {offsets = [0, 0], sizes = [8, 256], strides = [1, 1]} : vector<8x384xf32> to vector<8x256xf32>
    %154 = arith.addf %152, %153 : vector<8x256xf32>
    %155 = arith.negf %154 : vector<8x256xf32>
    %156 = math.exp %155 : vector<8x256xf32>
    %cst_48 = arith.constant 1.000000e+00 : f32
    %157 = vector.broadcast %cst_48 : f32 to vector<8x256xf32>
    %158 = arith.addf %157, %156 : vector<8x256xf32>
    %159 = arith.divf %157, %158 : vector<8x256xf32>
    %160 = vector.extract_strided_slice %159 {offsets = [0, 0], sizes = [8, 128], strides = [1, 1]} : vector<8x256xf32> to vector<8x128xf32>
    %161 = vector.extract_strided_slice %159 {offsets = [0, 128], sizes = [8, 128], strides = [1, 1]} : vector<8x256xf32> to vector<8x128xf32>
    %162 = vector.extract_strided_slice %146 {offsets = [0, 256], sizes = [8, 128], strides = [1, 1]} : vector<8x384xf32> to vector<8x128xf32>
    %163 = vector.extract_strided_slice %151 {offsets = [0, 256], sizes = [8, 128], strides = [1, 1]} : vector<8x384xf32> to vector<8x128xf32>
    %164 = arith.mulf %160, %163 : vector<8x128xf32>
    %165 = arith.addf %162, %164 : vector<8x128xf32>
    %166 = math.tanh %165 : vector<8x128xf32>
    %cst_49 = arith.constant 1.000000e+00 : f32
    %167 = vector.broadcast %cst_49 : f32 to vector<8x128xf32>
    %168 = arith.subf %167, %161 : vector<8x128xf32>
    %169 = arith.mulf %168, %166 : vector<8x128xf32>
    %170 = arith.mulf %161, %145 : vector<8x128xf32>
    %171 = arith.addf %169, %170 : vector<8x128xf32>
    %c48 = arith.constant 48 : index
    %c0_50 = arith.constant 0 : index
    %172 = vector.load %arg10[%c48, %c0_50] : memref<64x384xf32, #tpu.memory_space<vmem>>, vector<8x384xf32>
    %173 = arith.truncf %171 : vector<8x128xf32> to vector<8x128xbf16>
    %c0_51 = arith.constant 0 : index
    %c0_52 = arith.constant 0 : index
    %174 = vector.load %arg3[%c0_51, %c0_52] : memref<128x384xbf16, #tpu.memory_space<vmem>>, vector<128x384xbf16>
    %cst_53 = arith.constant dense<0.000000e+00> : vector<8x384xf32>
    %175 = tpu.matmul %173, %174, %cst_53 {dimension_numbers = #tpu.dot_dimension_numbers<[1], [0], [0], [1], [0, 0, 1, 1], [], []>} : vector<8x128xbf16>, vector<128x384xbf16>, vector<8x384xf32> -> vector<8x384xf32>
    %176 = vector.broadcast %14 : vector<1x384xf32> to vector<8x384xf32>
    %177 = arith.addf %175, %176 : vector<8x384xf32>
    %178 = vector.extract_strided_slice %172 {offsets = [0, 0], sizes = [8, 256], strides = [1, 1]} : vector<8x384xf32> to vector<8x256xf32>
    %179 = vector.extract_strided_slice %177 {offsets = [0, 0], sizes = [8, 256], strides = [1, 1]} : vector<8x384xf32> to vector<8x256xf32>
    %180 = arith.addf %178, %179 : vector<8x256xf32>
    %181 = arith.negf %180 : vector<8x256xf32>
    %182 = math.exp %181 : vector<8x256xf32>
    %cst_54 = arith.constant 1.000000e+00 : f32
    %183 = vector.broadcast %cst_54 : f32 to vector<8x256xf32>
    %184 = arith.addf %183, %182 : vector<8x256xf32>
    %185 = arith.divf %183, %184 : vector<8x256xf32>
    %186 = vector.extract_strided_slice %185 {offsets = [0, 0], sizes = [8, 128], strides = [1, 1]} : vector<8x256xf32> to vector<8x128xf32>
    %187 = vector.extract_strided_slice %185 {offsets = [0, 128], sizes = [8, 128], strides = [1, 1]} : vector<8x256xf32> to vector<8x128xf32>
    %188 = vector.extract_strided_slice %172 {offsets = [0, 256], sizes = [8, 128], strides = [1, 1]} : vector<8x384xf32> to vector<8x128xf32>
    %189 = vector.extract_strided_slice %177 {offsets = [0, 256], sizes = [8, 128], strides = [1, 1]} : vector<8x384xf32> to vector<8x128xf32>
    %190 = arith.mulf %186, %189 : vector<8x128xf32>
    %191 = arith.addf %188, %190 : vector<8x128xf32>
    %192 = math.tanh %191 : vector<8x128xf32>
    %cst_55 = arith.constant 1.000000e+00 : f32
    %193 = vector.broadcast %cst_55 : f32 to vector<8x128xf32>
    %194 = arith.subf %193, %187 : vector<8x128xf32>
    %195 = arith.mulf %194, %192 : vector<8x128xf32>
    %196 = arith.mulf %187, %171 : vector<8x128xf32>
    %197 = arith.addf %195, %196 : vector<8x128xf32>
    %c56 = arith.constant 56 : index
    %c0_56 = arith.constant 0 : index
    %198 = vector.load %arg10[%c56, %c0_56] : memref<64x384xf32, #tpu.memory_space<vmem>>, vector<8x384xf32>
    %199 = arith.truncf %197 : vector<8x128xf32> to vector<8x128xbf16>
    %c0_57 = arith.constant 0 : index
    %c0_58 = arith.constant 0 : index
    %200 = vector.load %arg3[%c0_57, %c0_58] : memref<128x384xbf16, #tpu.memory_space<vmem>>, vector<128x384xbf16>
    %cst_59 = arith.constant dense<0.000000e+00> : vector<8x384xf32>
    %201 = tpu.matmul %199, %200, %cst_59 {dimension_numbers = #tpu.dot_dimension_numbers<[1], [0], [0], [1], [0, 0, 1, 1], [], []>} : vector<8x128xbf16>, vector<128x384xbf16>, vector<8x384xf32> -> vector<8x384xf32>
    %202 = vector.broadcast %14 : vector<1x384xf32> to vector<8x384xf32>
    %203 = arith.addf %201, %202 : vector<8x384xf32>
    %204 = vector.extract_strided_slice %198 {offsets = [0, 0], sizes = [8, 256], strides = [1, 1]} : vector<8x384xf32> to vector<8x256xf32>
    %205 = vector.extract_strided_slice %203 {offsets = [0, 0], sizes = [8, 256], strides = [1, 1]} : vector<8x384xf32> to vector<8x256xf32>
    %206 = arith.addf %204, %205 : vector<8x256xf32>
    %207 = arith.negf %206 : vector<8x256xf32>
    %208 = math.exp %207 : vector<8x256xf32>
    %cst_60 = arith.constant 1.000000e+00 : f32
    %209 = vector.broadcast %cst_60 : f32 to vector<8x256xf32>
    %210 = arith.addf %209, %208 : vector<8x256xf32>
    %211 = arith.divf %209, %210 : vector<8x256xf32>
    %212 = vector.extract_strided_slice %211 {offsets = [0, 0], sizes = [8, 128], strides = [1, 1]} : vector<8x256xf32> to vector<8x128xf32>
    %213 = vector.extract_strided_slice %211 {offsets = [0, 128], sizes = [8, 128], strides = [1, 1]} : vector<8x256xf32> to vector<8x128xf32>
    %214 = vector.extract_strided_slice %198 {offsets = [0, 256], sizes = [8, 128], strides = [1, 1]} : vector<8x384xf32> to vector<8x128xf32>
    %215 = vector.extract_strided_slice %203 {offsets = [0, 256], sizes = [8, 128], strides = [1, 1]} : vector<8x384xf32> to vector<8x128xf32>
    %216 = arith.mulf %212, %215 : vector<8x128xf32>
    %217 = arith.addf %214, %216 : vector<8x128xf32>
    %218 = math.tanh %217 : vector<8x128xf32>
    %cst_61 = arith.constant 1.000000e+00 : f32
    %219 = vector.broadcast %cst_61 : f32 to vector<8x128xf32>
    %220 = arith.subf %219, %213 : vector<8x128xf32>
    %221 = arith.mulf %220, %218 : vector<8x128xf32>
    %222 = arith.mulf %213, %197 : vector<8x128xf32>
    %223 = arith.addf %221, %222 : vector<8x128xf32>
    %c0_62 = arith.constant 0 : index
    %c0_63 = arith.constant 0 : index
    %224 = vector.load %arg9[%c0_62, %c0_63] : memref<8x128xf32, #tpu.memory_space<vmem>>, vector<8x128xf32>
    tpu.vector_store %arg9[%c0_62, %c0_63], %223 {strides = array<i32>} : memref<8x128xf32, #tpu.memory_space<vmem>>, vector<8x128xf32>,
    %225 = arith.truncf %223 : vector<8x128xf32> to vector<8x128xbf16>
    %c0_64 = arith.constant 0 : index
    %c0_65 = arith.constant 0 : index
    %226 = vector.load %arg6[%c0_64, %c0_65] : memref<128x128xbf16, #tpu.memory_space<vmem>>, vector<128x128xbf16>
    %cst_66 = arith.constant dense<0.000000e+00> : vector<8x128xf32>
    %227 = tpu.matmul %225, %226, %cst_66 {dimension_numbers = #tpu.dot_dimension_numbers<[1], [0], [0], [1], [0, 0, 1, 1], [], []>} : vector<8x128xbf16>, vector<128x128xbf16>, vector<8x128xf32> -> vector<8x128xf32>
    %c0_67 = arith.constant 0 : index
    %c0_68 = arith.constant 0 : index
    %228 = vector.load %arg7[%c0_67, %c0_68] : memref<1x128xf32, #tpu.memory_space<vmem>>, vector<1x128xf32>
    %229 = vector.broadcast %228 : vector<1x128xf32> to vector<8x128xf32>
    %230 = arith.addf %227, %229 : vector<8x128xf32>
    %c0_69 = arith.constant 0 : index
    %c0_70 = arith.constant 0 : index
    %231 = vector.load %arg8[%c0_69, %c0_70] : memref<8x128xf32, #tpu.memory_space<vmem>>, vector<8x128xf32>
    tpu.vector_store %arg8[%c0_69, %c0_70], %230 {strides = array<i32>} : memref<8x128xf32, #tpu.memory_space<vmem>>, vector<8x128xf32>,
    return
  }
}

</mosaic_0001>

<bundles_post_ra>
// kernel: tpu_custom_call.1
= control target key start
LH: loop header
LB: loop body
LE: loop exit
PB: predicated region body
PF: predicated region fallthrough
CT: control target
= control target key end

     0   :  { %15 = vsyncpa [#allocation4], 0  ;;  %s2523_s0 = inlined_call_operand.vmem [shape: s32[64,1], index: 0, kind: input, shape index: {}]   ;;  %s2524_s1 = inlined_call_operand.hbm [shape: f32[8,128], index: 1, kind: input, shape index: {}]   ;;  %s2525_s2 = inlined_call_operand.hbm [shape: bf16[128,384], index: 2, kind: input, shape index: {}]   ;;  %s2526_s3 = inlined_call_operand.hbm [shape: bf16[128,384], index: 3, kind: input, shape index: {}]   ;;  %s2527_s4 = inlined_call_operand.vmem [shape: f32[1,384], index: 4, kind: input, shape index: {}]   ;;  %s2528_s5 = inlined_call_operand.vmem [shape: f32[1,384], index: 5, kind: input, shape index: {}]   ;;  %s2529_s6 = inlined_call_operand.vmem [shape: bf16[128,128], index: 6, kind: input, shape index: {}]   ;;  %s2530_s7 = inlined_call_operand.vmem [shape: f32[1,128], index: 7, kind: input, shape index: {}]   ;;  %s2531_s8 = inlined_call_operand.hbm [shape: f32[8,128], index: 8, kind: output, shape index: {0}]   ;;  %s2532_s9 = inlined_call_operand.hbm [shape: f32[8,128], index: 9, kind: output, shape index: {1}]  }
   0x1   :  { %16 = vsyncpa [#allocation7], 0 }
   0x2   :  { %17 = vsyncpa [#allocation5], 0  ;;  %s36_s11 = sshll.u32 %s2525_s2, 4  ;;  %s37_s11 = int_to_ptr.hbm [resolvable:$true] %s36_s11 }
   0x3   :  { %18 = vsyncpa [#allocation11], 0  ;;  %s1959_s12 = smov [#allocation6]   ;;  %s26_s16 = sshll.u32 %s2524_s1, 4  ;;  %s27_s16 = int_to_ptr.hbm [resolvable:$true] %s26_s16 }
   0x4   :  { %s38_s13 = sshll.u32 %s1959_s12, 4  ;;  %s1960_s17 = smov 192   ;;  %s39_s13 = int_to_ptr.vmem [resolvable:$true] %s38_s13 }
   0x5   :  { %s1961_s18 = smov 12   ;;  %s1962_s19 = smov [#allocation3]  }
   0x6   :  { %44 = dma.hbm_to_vmem [thread:$0]  %s37_s11, 3072, %s39_s13, [#allocation7], %s1960_s17, %s1960_s17, %s1961_s18  }
   0x7   :  { %s28_s20 = sshll.u32 %s1962_s19, 4  ;;  %s49_s23 = sshll.u32 %s2526_s3, 4  ;;  %s29_s20 = int_to_ptr.vmem [resolvable:$true] %s28_s20  ;;  %s50_s23 = int_to_ptr.hbm [resolvable:$true] %s49_s23 }
   0x8   :  { %31 = dma.hbm_to_vmem [thread:$0]  %s27_s16, 128, %s29_s20, [#allocation4]  }
   0x9   :  { %s1963_s2 = smov [#allocation8]  }
   0xa   :  { %s51_s24 = sshll.u32 %s1963_s2, 4  ;;  %s52_s24 = int_to_ptr.vmem [resolvable:$true] %s51_s24 }
   0xb   :  { %57 = dma.hbm_to_vmem [thread:$0]  %s50_s23, 3072, %s52_s24, [#allocation7], %s1960_s17, %s1960_s17, %s1961_s18  }
   0xc   :  { %1951 = dma.done.wait [#allocation4], 128  }
   0xd   :  { %1952 = vsyncadd [#allocation4], 4294967168 }
   0xe   :  { %1953 = dma.done.wait [#allocation7], 6144  }
   0xf   :  { %1954 = vsyncadd [#allocation7], 4294961152  ;;  %v1964_v0 = vmov 0   ;;  %v80_v1 = vld [vmem:[%s2523_s0 + $0x10] sm:$0xff]  ;;  %v78_v2 = vld [vmem:[%s2523_s0] sm:$0xff]  ;;  %s1402_s14 = sshll.u32 %s2532_s9, 4  ;;  %s1403_s14 = int_to_ptr.hbm [resolvable:$true] %s1402_s14 }
  0x10   :  { %1748 = vset.pattern.permute.xlu1 %v1964_v0  ;;  %1747 = vset.pattern.permute.xlu0 %v1964_v0  ;;  %v82_v3 = vld [vmem:[%s2523_s0 + $0x20] sm:$0xff]  ;;  %v1624_v4 = vld [vmem:[#allocation8 + $0xa8] sm:$0xf]  ;;  %v1728_v5 = vld [vmem:[#allocation8 + $0xb0] sm:$0xf0]  ;;  %s1967_s17 = smov [#allocation9]  }
  0x11   :  { %1749 = vset.pattern.permute.xlu2 %v1964_v0  ;;  %95 = vperm.xlu1 %1748, %v80_v1   ;;  %v1612_v6 = vld [vmem:[#allocation8 + $0x90] sm:$0xf]  ;;  %v1725_v7 = vld [vmem:[#allocation8 + $0x98] sm:$0xf0]  ;;  %v2036_v8 = vor.u32 %v1728_v5, %v1624_v4  ;;  %v79_v10 = vld [vmem:[%s2523_s0 + $0x8] sm:$0xff]  ;;  %s1391_s20 = sshll.u32 %s2531_s8, 4  ;;  %s1392_s20 = int_to_ptr.hbm [resolvable:$true] %s1391_s20 }
  0x12   :  { %89 = vperm.xlu0 %1747, %v78_v2   ;;  %101 = vperm.xlu2 %1749, %v82_v3   ;;  %v81_v9 = vld [vmem:[%s2523_s0 + $0x18] sm:$0xff]  ;;  %v2045_v11 = vor.u32 %v1725_v7, %v1612_v6  ;;  %v1600_v12 = vld [vmem:[#allocation8 + $0x78] sm:$0xf]  ;;  %v1722_v13 = vld [vmem:[#allocation8 + $0x80] sm:$0xf0] }
  0x13   :  { %584 = vmatpush.bf16.msra.mxu3 %v2036_v8  ;;  %v83_v14 = vld [vmem:[%s2523_s0 + $0x28] sm:$0xff]  ;;  %v1504_v15 = vld [vmem:[#allocation6 + $0xa8] sm:$0xf]  ;;  %v1704_v16 = vld [vmem:[#allocation6 + $0xb0] sm:$0xf0]  ;;  %v2051_v17 = vor.u32 %v1722_v13, %v1600_v12 }
  0x14   :  { %v1505_v18 = vor.u32 %v1704_v16, %v1504_v15  ;;  %v1703_v19 = vld [vmem:[#allocation6 + $0xac] sm:$0xf]  ;;  %v1506_v20 = vld [vmem:[#allocation6 + $0xb4] sm:$0xf0]  ;;  %v1512_v21 = vld [vmem:[#allocation6 + $0xb0] sm:$0xf] }
  0x15   :  { %v1588_v22 = vld [vmem:[#allocation8 + $0x60] sm:$0xf]  ;;  %v1719_v23 = vld [vmem:[#allocation8 + $0x68] sm:$0xf0]  ;;  %v1509_v24 = vor.u32 %v1703_v19, %v1506_v20  ;;  %v1705_v25 = vld [vmem:[#allocation6 + $0xb8] sm:$0xf0] }
  0x16   :  { %v85_v26 = vld [vmem:[%s2523_s0 + $0x38] sm:$0xff]  ;;  %v84_v27 = vld [vmem:[%s2523_s0 + $0x30] sm:$0xff]  ;;  %300 = vmatpush.bf16.msra.mxu0 %v1505_v18  ;;  %v1513_v28 = vor.u32 %v1705_v25, %v1512_v21  ;;  %v1701_v30 = vld [vmem:[#allocation6 + $0x98] sm:$0xf0]  ;;  %v2060_v36 = vor.u32 %v1719_v23, %v1588_v22  ;;  %s1389_s0 = sshll.u32 %s1967_s17, 4  ;;  %s1390_s0 = int_to_ptr.vmem [resolvable:$true] %s1389_s0 }
  0x17   :  { %585 = vmatpush.bf16.msra.mxu3 %v2045_v11  ;;  %v1492_v29 = vld [vmem:[#allocation6 + $0x90] sm:$0xf]  ;;  %v1700_v31 = vld [vmem:[#allocation6 + $0x94] sm:$0xf]  ;;  %329 = vmatpush.bf16.msra.mxu1 %v1509_v24  ;;  %v1494_v33 = vld [vmem:[#allocation6 + $0x9c] sm:$0xf0] }
  0x18   :  { %v1493_v32 = vor.u32 %v1701_v30, %v1492_v29  ;;  %v1500_v34 = vld [vmem:[#allocation6 + $0x98] sm:$0xf]  ;;  %v1702_v35 = vld [vmem:[#allocation6 + $0xa0] sm:$0xf0]  ;;  %v1576_v37 = vld [vmem:[#allocation8 + $0x48] sm:$0xf]  ;;  %358 = vmatpush.bf16.msra.mxu2 %v1513_v28  ;;  %v1497_v39 = vor.u32 %v1700_v31, %v1494_v33 }
  0x19   :  { %98 = vperm.xlu1 %1748, %v81_v9   ;;  %v1716_v38 = vld [vmem:[#allocation8 + $0x50] sm:$0xf0]  ;;  %v1501_v40 = vor.u32 %v1702_v35, %v1500_v34  ;;  %v1480_v41 = vld [vmem:[#allocation6 + $0x78] sm:$0xf]  ;;  %v1698_v42 = vld [vmem:[#allocation6 + $0x80] sm:$0xf0] }
  0x1a   :  { %92 = vperm.xlu0 %1747, %v79_v10   ;;  %104 = vperm.xlu2 %1749, %v83_v14   ;;  %v1697_v43 = vld [vmem:[#allocation6 + $0x7c] sm:$0xf]  ;;  %v1481_v44 = vor.u32 %v1698_v42, %v1480_v41  ;;  %v1482_v45 = vld [vmem:[#allocation6 + $0x84] sm:$0xf0]  ;;  %v1488_v46 = vld [vmem:[#allocation6 + $0x80] sm:$0xf]  ;;  %v2063_v48 = vor.u32 %v1716_v38, %v1576_v37 }
  0x1b   :  { %586 = vmatpush.bf16.msra.mxu3 %v2051_v17  ;;  %301 = vmatpush.bf16.msra.mxu0 %v1493_v32  ;;  %v1699_v47 = vld [vmem:[#allocation6 + $0x88] sm:$0xf0]  ;;  %v1564_v49 = vld [vmem:[#allocation8 + $0x30] sm:$0xf]  ;;  %v1713_v50 = vld [vmem:[#allocation8 + $0x38] sm:$0xf0]  ;;  %v1485_v51 = vor.u32 %v1697_v43, %v1482_v45 }
  0x1c   :  { %330 = vmatpush.bf16.msra.mxu1 %v1497_v39  ;;  %359 = vmatpush.bf16.msra.mxu2 %v1501_v40  ;;  %v1489_v52 = vor.u32 %v1699_v47, %v1488_v46  ;;  %v1468_v53 = vld [vmem:[#allocation6 + $0x60] sm:$0xf]  ;;  %v1695_v54 = vld [vmem:[#allocation6 + $0x68] sm:$0xf0]  ;;  %v1694_v55 = vld [vmem:[#allocation6 + $0x64] sm:$0xf]  ;;  %v2066_v60 = vor.u32 %v1713_v50, %v1564_v49 }
  0x1d   :  { %v1469_v56 = vor.u32 %v1695_v54, %v1468_v53  ;;  %v1470_v57 = vld [vmem:[#allocation6 + $0x6c] sm:$0xf0]  ;;  %v1476_v58 = vld [vmem:[#allocation6 + $0x68] sm:$0xf]  ;;  %v1696_v59 = vld [vmem:[#allocation6 + $0x70] sm:$0xf0] }
  0x1e   :  { %v1552_v61 = vld [vmem:[#allocation8 + $0x18] sm:$0xf]  ;;  %v1710_v62 = vld [vmem:[#allocation8 + $0x20] sm:$0xf0]  ;;  %v1473_v63 = vor.u32 %v1694_v55, %v1470_v57  ;;  %v1477_v0 = vor.u32 %v1696_v59, %v1476_v58  ;;  %v1456_v1 = vld [vmem:[#allocation6 + $0x48] sm:$0xf] }
  0x1f   :  { %587 = vmatpush.bf16.msra.mxu3 %v2060_v36  ;;  %302 = vmatpush.bf16.msra.mxu0 %v1481_v44  ;;  %v1692_v2 = vld [vmem:[#allocation6 + $0x50] sm:$0xf0]  ;;  %v1691_v3 = vld [vmem:[#allocation6 + $0x4c] sm:$0xf]  ;;  %v1458_v5 = vld [vmem:[#allocation6 + $0x54] sm:$0xf0]  ;;  %v2069_v10 = vor.u32 %v1710_v62, %v1552_v61 }
  0x20   :  { %331 = vmatpush.bf16.msra.mxu1 %v1485_v51  ;;  %360 = vmatpush.bf16.msra.mxu2 %v1489_v52  ;;  %v1457_v4 = vor.u32 %v1692_v2, %v1456_v1  ;;  %v1464_v6 = vld [vmem:[#allocation6 + $0x50] sm:$0xf]  ;;  %v1693_v7 = vld [vmem:[#allocation6 + $0x58] sm:$0xf0]  ;;  %v1540_v9 = vld [vmem:[#allocation8] sm:$0xf]  ;;  %v1461_v15 = vor.u32 %v1691_v3, %v1458_v5 }
  0x21   :  { %110 = vperm.xlu1 %1748, %v85_v26   ;;  %v1707_v12 = vld [vmem:[#allocation8 + $0x8] sm:$0xf0]  ;;  %v1626_v14 = vld [vmem:[#allocation8 + $0xb4] sm:$0xf0]  ;;  %v1465_v16 = vor.u32 %v1693_v7, %v1464_v6  ;;  %v1444_v18 = vld [vmem:[#allocation6 + $0x30] sm:$0xf] }
  0x22   :  { %107 = vperm.xlu0 %1747, %v84_v27   ;;  %v1727_v13 = vld [vmem:[#allocation8 + $0xac] sm:$0xf]  ;;  %v1689_v19 = vld [vmem:[#allocation6 + $0x38] sm:$0xf0]  ;;  %v1688_v20 = vld [vmem:[#allocation6 + $0x34] sm:$0xf]  ;;  %v2072_v25 = vor.u32 %v1707_v12, %v1540_v9 }
  0x23   :  { %588 = vmatpush.bf16.msra.mxu3 %v2063_v48  ;;  %303 = vmatpush.bf16.msra.mxu0 %v1469_v56  ;;  %v1445_v21 = vor.u32 %v1689_v19, %v1444_v18  ;;  %v1446_v22 = vld [vmem:[#allocation6 + $0x3c] sm:$0xf0]  ;;  %v1452_v23 = vld [vmem:[#allocation6 + $0x38] sm:$0xf]  ;;  %v1690_v24 = vld [vmem:[#allocation6 + $0x40] sm:$0xf0]  ;;  %v2076_v28 = vor.u32 %v1727_v13, %v1626_v14 }
  0x24   :  { %332 = vmatpush.bf16.msra.mxu1 %v1473_v63  ;;  %361 = vmatpush.bf16.msra.mxu2 %v1477_v0  ;;  %v2074_v26 = vld [vmem:[#allocation3] sm:$0xff]  ;;  %v1449_v27 = vor.u32 %v1688_v20, %v1446_v22  ;;  %v1453_v29 = vor.u32 %v1690_v24, %v1452_v23  ;;  %v1724_v30 = vld [vmem:[#allocation8 + $0x94] sm:$0xf]  ;;  %v1614_v31 = vld [vmem:[#allocation8 + $0x9c] sm:$0xf0] }
  0x25   :  { %v2080_v32 = vpack.c.bf16 %v2074_v26, %v2074_v26  ;;  %v2084_v33 = vor.u32 %v1724_v30, %v1614_v31  ;;  %v1721_v34 = vld [vmem:[#allocation8 + $0x7c] sm:$0xf]  ;;  %v1602_v35 = vld [vmem:[#allocation8 + $0x84] sm:$0xf0]  ;;  %v1718_v38 = vld [vmem:[#allocation8 + $0x64] sm:$0xf] }
  0x26   :  { %v2088_v37 = vor.u32 %v1721_v34, %v1602_v35  ;;  %v1590_v39 = vld [vmem:[#allocation8 + $0x6c] sm:$0xf0]  ;;  %v1715_v41 = vld [vmem:[#allocation8 + $0x4c] sm:$0xf]  ;;  %v1578_v42 = vld [vmem:[#allocation8 + $0x54] sm:$0xf0] }
  0x27   :  { %589 = vmatpush.bf16.msra.mxu3 %v2066_v60  ;;  %304 = vmatpush.bf16.msra.mxu0 %v1457_v4  ;;  %v2091_v40 = vor.u32 %v1718_v38, %v1590_v39  ;;  %v2094_v43 = vor.u32 %v1715_v41, %v1578_v42  ;;  %v1712_v44 = vld [vmem:[#allocation8 + $0x34] sm:$0xf]  ;;  %v1566_v45 = vld [vmem:[#allocation8 + $0x3c] sm:$0xf0]  ;;  %v1709_v47 = vld [vmem:[#allocation8 + $0x1c] sm:$0xf] }
  0x28   :  { %333 = vmatpush.bf16.msra.mxu1 %v1461_v15  ;;  %362 = vmatpush.bf16.msra.mxu2 %v1465_v16  ;;  %v2097_v46 = vor.u32 %v1712_v44, %v1566_v45  ;;  %v1554_v49 = vld [vmem:[#allocation8 + $0x24] sm:$0xf0]  ;;  %v1706_v51 = vld [vmem:[#allocation8 + $0x4] sm:$0xf]  ;;  %v1542_v52 = vld [vmem:[#allocation8 + $0xc] sm:$0xf0] }
  0x29   :  { %v2100_v50 = vor.u32 %v1709_v47, %v1554_v49  ;;  %v2103_v53 = vor.u32 %v1706_v51, %v1542_v52  ;;  %v1432_v54 = vld [vmem:[#allocation6 + $0x18] sm:$0xf]  ;;  %v1686_v55 = vld [vmem:[#allocation6 + $0x20] sm:$0xf0]  ;;  %v1685_v56 = vld [vmem:[#allocation6 + $0x1c] sm:$0xf] }
  0x2a   :  { %v1433_v57 = vor.u32 %v1686_v55, %v1432_v54  ;;  %v1434_v58 = vld [vmem:[#allocation6 + $0x24] sm:$0xf0]  ;;  %v1440_v59 = vld [vmem:[#allocation6 + $0x20] sm:$0xf]  ;;  %v1687_v61 = vld [vmem:[#allocation6 + $0x28] sm:$0xf0] }
  0x2b   :  { %590 = vmatpush.bf16.msra.mxu3 %v2069_v10  ;;  %305 = vmatpush.bf16.msra.mxu0 %v1445_v21  ;;  %v1437_v62 = vor.u32 %v1685_v56, %v1434_v58  ;;  %v1441_v63 = vor.u32 %v1687_v61, %v1440_v59  ;;  %v1420_v0 = vld [vmem:[#allocation6] sm:$0xf]  ;;  %v1683_v1 = vld [vmem:[#allocation6 + $0x8] sm:$0xf0]  ;;  %v1682_v2 = vld [vmem:[#allocation6 + $0x4] sm:$0xf] }
  0x2c   :  { %334 = vmatpush.bf16.msra.mxu1 %v1449_v27  ;;  %363 = vmatpush.bf16.msra.mxu2 %v1453_v29  ;;  %v1421_v3 = vor.u32 %v1683_v1, %v1420_v0  ;;  %v1422_v4 = vld [vmem:[#allocation6 + $0xc] sm:$0xf0]  ;;  %v1428_v5 = vld [vmem:[#allocation6 + $0x8] sm:$0xf]  ;;  %v1684_v6 = vld [vmem:[#allocation6 + $0x10] sm:$0xf0]  ;;  %v86_v29 = vlaneseq }
  0x2d   :  { %v1425_v7 = vor.u32 %v1682_v2, %v1422_v4  ;;  %v1429_v9 = vor.u32 %v1684_v6, %v1428_v5  ;;  %v1632_v12 = vld [vmem:[#allocation8 + $0xb0] sm:$0xf]  ;;  %v1729_v13 = vld [vmem:[#allocation8 + $0xb8] sm:$0xf0]  ;;  %v1620_v15 = vld [vmem:[#allocation8 + $0x98] sm:$0xf] }
  0x2e   :  { %v2109_v14 = vor.u32 %v1729_v13, %v1632_v12  ;;  %v1726_v16 = vld [vmem:[#allocation8 + $0xa0] sm:$0xf0]  ;;  %v1608_v19 = vld [vmem:[#allocation8 + $0x80] sm:$0xf]  ;;  %v1723_v20 = vld [vmem:[#allocation8 + $0x88] sm:$0xf0] }
  0x2f   :  { %591 = vmatpush.bf16.msra.mxu3 %v2072_v25  ;;  %306 = vmatpush.bf16.msra.mxu0 %v1433_v57  ;;  %v2117_v18 = vor.u32 %v1726_v16, %v1620_v15  ;;  %v1596_v21 = vld [vmem:[#allocation8 + $0x68] sm:$0xf]  ;;  %v2125_v22 = vor.u32 %v1723_v20, %v1608_v19  ;;  %v1720_v23 = vld [vmem:[#allocation8 + $0x70] sm:$0xf0]  ;;  %v2137_v30 = vand.u32 127, %v86_v29 }
  0x30   :  { %335 = vmatpush.bf16.msra.mxu1 %v1437_v62  ;;  %364 = vmatpush.bf16.msra.mxu2 %v1441_v63  ;;  %v2130_v27 = vor.u32 %v1720_v23, %v1596_v21  ;;  %v1965_v34 = vmov 1.0|1.0   ;;  %v1584_v38 = vld [vmem:[#allocation8 + $0x50] sm:$0xf]  ;;  %v1717_v39 = vld [vmem:[#allocation8 + $0x58] sm:$0xf0] }
  0x31   :  { %v1572_v41 = vld [vmem:[#allocation8 + $0x38] sm:$0xf]  ;;  %v2147_v42 = vor.u32 %v1717_v39, %v1584_v38  ;;  %v1714_v44 = vld [vmem:[#allocation8 + $0x40] sm:$0xf0]  ;;  %v1560_v51 = vld [vmem:[#allocation8 + $0x20] sm:$0xf] }
  0x32   :  { %592 = vmatmul.bf16.vlgmr.msra.gmra.mxu3 %v2080_v32  ;;  %v2151_v45 = vor.u32 %v1714_v44, %v1572_v41  ;;  %v1711_v52 = vld [vmem:[#allocation8 + $0x28] sm:$0xf0]  ;;  %v1548_v54 = vld [vmem:[#allocation8 + $0x8] sm:$0xf]  ;;  %v1708_v56 = vld [vmem:[#allocation8 + $0x10] sm:$0xf0] }
  0x33   :  { %597 = vmatpush.bf16.msrb.mxu3 %v2076_v28  ;;  %307 = vmatpush.bf16.msra.mxu0 %v1421_v3  ;;  %v2168_v55 = vor.u32 %v1711_v52, %v1560_v51  ;;  %v2172_v57 = vor.u32 %v1708_v56, %v1548_v54  ;;  %v164_v3 = vld [vmem:[%s2527_s4] sm:$0x7] }
  0x34   :  { %336 = vmatpush.bf16.msra.mxu1 %v1425_v7  ;;  %365 = vmatpush.bf16.msra.mxu2 %v1429_v9  ;;  %v2224_v4 = vld [vmem:[%s2528_s5] sm:$0x7]  ;;  %v2226_v5 = vperm.slane %v164_v3, 0  ;;  %v2228_v6 = vperm.slane %v164_v3, 1  ;;  %v2243_v21 = vperm.slane %v164_v3, 2 }
  0x35   :  { %v2233_v13 = vperm.slane %v2224_v4, 0 }
  0x36   :  { %2534 = vst [vmem:[#allocation16_spill] sm:$0xff] %v2228_v6 }
  0x37   :  { %598 = vmatpush.bf16.msrb.mxu3 %v2084_v33  ;;  %610 = vmatpush.bf16.msrb.mxu0 %v2109_v14 }
  0x38   :  { %674 = vmatpush.bf16.msrb.mxu1 %v2036_v8  ;;  %687 = vmatpush.bf16.msrb.mxu2 %v2076_v28 }
  0x3b   :  { %599 = vmatpush.bf16.msrb.mxu3 %v2088_v37  ;;  %611 = vmatpush.bf16.msrb.mxu0 %v2117_v18 }
  0x3c   :  { %675 = vmatpush.bf16.msrb.mxu1 %v2045_v11  ;;  %688 = vmatpush.bf16.msrb.mxu2 %v2084_v33 }
  0x3f   :  { %600 = vmatpush.bf16.msrb.mxu3 %v2091_v40  ;;  %612 = vmatpush.bf16.msrb.mxu0 %v2125_v22 }
  0x40   :  { %676 = vmatpush.bf16.msrb.mxu1 %v2051_v17  ;;  %689 = vmatpush.bf16.msrb.mxu2 %v2088_v37 }
  0x43   :  { %601 = vmatpush.bf16.msrb.mxu3 %v2094_v43  ;;  %613 = vmatpush.bf16.msrb.mxu0 %v2130_v27 }
  0x44   :  { %677 = vmatpush.bf16.msrb.mxu1 %v2060_v36  ;;  %690 = vmatpush.bf16.msrb.mxu2 %v2091_v40 }
  0x47   :  { %602 = vmatpush.bf16.msrb.mxu3 %v2097_v46  ;;  %614 = vmatpush.bf16.msrb.mxu0 %v2147_v42 }
  0x48   :  { %678 = vmatpush.bf16.msrb.mxu1 %v2063_v48  ;;  %691 = vmatpush.bf16.msrb.mxu2 %v2094_v43 }
  0x4b   :  { %603 = vmatpush.bf16.msrb.mxu3 %v2100_v50  ;;  %615 = vmatpush.bf16.msrb.mxu0 %v2151_v45 }
  0x4c   :  { %679 = vmatpush.bf16.msrb.mxu1 %v2066_v60  ;;  %692 = vmatpush.bf16.msrb.mxu2 %v2097_v46 }
  0x4f   :  { %604 = vmatpush.bf16.msrb.mxu3 %v2103_v53  ;;  %616 = vmatpush.bf16.msrb.mxu0 %v2168_v55 }
  0x50   :  { %680 = vmatpush.bf16.msrb.mxu1 %v2069_v10  ;;  %693 = vmatpush.bf16.msrb.mxu2 %v2100_v50 }
  0x52   :  { %605 = vmatmul.bf16.vlgmr.msrb.gmra.mxu3 %v2080_v32 }
  0x53   :  { %700 = vmatpush.bf16.msra.mxu3 %v2109_v14  ;;  %617 = vmatpush.bf16.msrb.mxu0 %v2172_v57 }
  0x54   :  { %681 = vmatpush.bf16.msrb.mxu1 %v2072_v25  ;;  %694 = vmatpush.bf16.msrb.mxu2 %v2103_v53 }
  0x57   :  { %701 = vmatpush.bf16.msra.mxu3 %v2117_v18 }
  0x5b   :  { %702 = vmatpush.bf16.msra.mxu3 %v2125_v22 }
  0x5f   :  { %703 = vmatpush.bf16.msra.mxu3 %v2130_v27 }
  0x63   :  { %704 = vmatpush.bf16.msra.mxu3 %v2147_v42 }
  0x67   :  { %705 = vmatpush.bf16.msra.mxu3 %v2151_v45 }
  0x6b   :  { %706 = vmatpush.bf16.msra.mxu3 %v2168_v55 }
  0x6c   :  { %v102_v49 = vpop.permute.xlu2 %101 }
  0x6d   :  { %vm116_vm6 = vcmp.eq.s32.totalorder %v2137_v30, %v102_v49 }
  0x6f   :  { %707 = vmatpush.bf16.msra.mxu3 %v2172_v57 }
  0x73   :  { %854 = vmatpush.bf16.msrb.mxu3 %v2036_v8 }
  0x74   :  { %v105_v58 = vpop.permute.xlu2 %104 }
  0x75   :  { %vm117_vm7 = vcmp.eq.s32.totalorder %v2137_v30, %v105_v58 }
  0x76   :  { %vm1518_vm8 = vmpackc.low %vm117_vm7, %vm116_vm6 }
  0x77   :  { %855 = vmatpush.bf16.msrb.mxu3 %v2045_v11 }
  0x7b   :  { %856 = vmatpush.bf16.msrb.mxu3 %v2051_v17 }
  0x7f   :  { %857 = vmatpush.bf16.msrb.mxu3 %v2060_v36 }
  0x83   :  { %v96_v35 = vpop.permute.xlu1 %95  ;;  %858 = vmatpush.bf16.msrb.mxu3 %v2063_v48 }
  0x84   :  { %v90_v24 = vpop.permute.xlu0 %89  ;;  %vm114_vm3 = vcmp.eq.s32.totalorder %v2137_v30, %v96_v35 }
  0x85   :  { %vm112_vm1 = vcmp.eq.s32.totalorder %v2137_v30, %v90_v24  ;;  %v2246_v24 = vperm.slane %v2224_v4, 1 }
  0x87   :  { %859 = vmatpush.bf16.msrb.mxu3 %v2066_v60 }
  0x8b   :  { %v99_v47 = vpop.permute.xlu1 %98  ;;  %860 = vmatpush.bf16.msrb.mxu3 %v2069_v10 }
  0x8c   :  { %v93_v31 = vpop.permute.xlu0 %92  ;;  %vm115_vm4 = vcmp.eq.s32.totalorder %v2137_v30, %v99_v47 }
  0x8d   :  { %vm113_vm0 = vcmp.eq.s32.totalorder %v2137_v30, %v93_v31  ;;  %vm1516_vm5 = vmpackc.low %vm115_vm4, %vm114_vm3 }
  0x8e   :  { %vm1514_vm2 = vmpackc.low %vm113_vm0, %vm112_vm1 }
  0x8f   :  { %1515 = vmatmul.msk.bf16.vlgmr.msra.gmra.mxu0 %vm1514_vm2, %v1965_v34  ;;  %1523 = vmatmul.msk.bf16.vlgmr.msra.gmra.mxu1 %vm1514_vm2, %v1965_v34 }
  0x90   :  { %1531 = vmatmul.msk.bf16.vlgmr.msra.gmra.mxu2 %vm1514_vm2, %v1965_v34  ;;  %777 = vmatpush.bf16.msra.mxu1 %v2076_v28 }
  0x91   :  { %790 = vmatpush.bf16.msra.mxu2 %v2109_v14  ;;  %764 = vmatpush.bf16.msra.mxu0 %v2036_v8 }
  0x92   :  { %861 = vmatpush.bf16.msrb.mxu3 %v2072_v25 }
  0x93   :  { %v111_v59 = vpop.permute.xlu1 %110 }
  0x94   :  { %778 = vmatpush.bf16.msra.mxu1 %v2084_v33  ;;  %v108_v61 = vpop.permute.xlu0 %107  ;;  %vm119_vm9 = vcmp.eq.s32.totalorder %v2137_v30, %v111_v59 }
  0x95   :  { %791 = vmatpush.bf16.msra.mxu2 %v2117_v18  ;;  %765 = vmatpush.bf16.msra.mxu0 %v2045_v11  ;;  %vm118_vm10 = vcmp.eq.s32.totalorder %v2137_v30, %v108_v61 }
  0x96   :  { %vm1520_vm11 = vmpackc.low %vm119_vm9, %vm118_vm10 }
  0x98   :  { %779 = vmatpush.bf16.msra.mxu1 %v2088_v37 }
  0x99   :  { %792 = vmatpush.bf16.msra.mxu2 %v2125_v22  ;;  %766 = vmatpush.bf16.msra.mxu0 %v2051_v17 }
  0x9c   :  { %780 = vmatpush.bf16.msra.mxu1 %v2091_v40 }
  0x9d   :  { %793 = vmatpush.bf16.msra.mxu2 %v2130_v27  ;;  %767 = vmatpush.bf16.msra.mxu0 %v2060_v36 }
  0x9f   :  { %1517 = vmatmul.msk.bf16.gmra.mxu0 %vm1516_vm5, %v1965_v34  ;;  %1525 = vmatmul.msk.bf16.gmra.mxu1 %vm1516_vm5, %v1965_v34 }
  0xa0   :  { %1533 = vmatmul.msk.bf16.gmra.mxu2 %vm1516_vm5, %v1965_v34  ;;  %781 = vmatpush.bf16.msra.mxu1 %v2094_v43 }
  0xa1   :  { %794 = vmatpush.bf16.msra.mxu2 %v2147_v42  ;;  %768 = vmatpush.bf16.msra.mxu0 %v2063_v48 }
  0xa4   :  { %782 = vmatpush.bf16.msra.mxu1 %v2097_v46 }
  0xa5   :  { %795 = vmatpush.bf16.msra.mxu2 %v2151_v45  ;;  %769 = vmatpush.bf16.msra.mxu0 %v2066_v60 }
  0xa8   :  { %783 = vmatpush.bf16.msra.mxu1 %v2100_v50 }
  0xa9   :  { %796 = vmatpush.bf16.msra.mxu2 %v2168_v55  ;;  %770 = vmatpush.bf16.msra.mxu0 %v2069_v10 }
  0xac   :  { %784 = vmatpush.bf16.msra.mxu1 %v2103_v53 }
  0xad   :  { %797 = vmatpush.bf16.msra.mxu2 %v2172_v57  ;;  %771 = vmatpush.bf16.msra.mxu0 %v2072_v25 }
  0xaf   :  { %1519 = vmatmul.msk.bf16.gmra.mxu0 %vm1518_vm8, %v1965_v34  ;;  %1527 = vmatmul.msk.bf16.gmra.mxu1 %vm1518_vm8, %v1965_v34 }
  0xb0   :  { %1535 = vmatmul.msk.bf16.gmra.mxu2 %vm1518_vm8, %v1965_v34 }
  0xb5   :  { %v593_v62 = vpop.f32.mrf.mxu3 }
  0xb6   :  { %v594_v19 = vadd.f32 %v593_v62, %v2233_v13 }
  0xbd   :  { %v595_v63 = vpop.f32.mrf.mxu3 }
  0xbf   :  { %1521 = vmatmul.msk.bf16.gmra.mxu0 %vm1520_vm11, %v1965_v34  ;;  %1529 = vmatmul.msk.bf16.gmra.mxu1 %vm1520_vm11, %v1965_v34 }
  0xc0   :  { %1537 = vmatmul.msk.bf16.gmra.mxu2 %vm1520_vm11, %v1965_v34 }
  0xcf   :  { %618 = vmatmul.bf16.vlgmr.msrb.gmra.mxu0 %v2080_v32 }
  0xd0   :  { %867 = vmatpush.bf16.msrb.mxu0 %v2076_v28 }
  0xd4   :  { %868 = vmatpush.bf16.msrb.mxu0 %v2084_v33 }
  0xd5   :  { %v606_v0 = vpop.f32.mrf.mxu3 }
  0xd6   :  { %v607_v41 = vadd.f32 %v606_v0, %v2246_v24 }
  0xd8   :  { %869 = vmatpush.bf16.msrb.mxu0 %v2088_v37 }
  0xdc   :  { %870 = vmatpush.bf16.msrb.mxu0 %v2091_v40 }
  0xdd   :  { %v608_v1 = vpop.f32.mrf.mxu3 }
  0xe0   :  { %871 = vmatpush.bf16.msrb.mxu0 %v2094_v43 }
  0xe4   :  { %872 = vmatpush.bf16.msrb.mxu0 %v2097_v46 }
  0xe8   :  { %873 = vmatpush.bf16.msrb.mxu0 %v2100_v50 }
  0xec   :  { %874 = vmatpush.bf16.msrb.mxu0 %v2103_v53 }
 0x10c   :  { %v309_v2 = vpop.f32.mrf.mxu0  ;;  %v338_v32 = vpop.f32.mrf.mxu1 }
 0x10d   :  { %v310_v20 = vadd.f32 %v309_v2, %v2226_v5  ;;  %v339_v39 = vadd.f32 %v338_v32, %v2228_v6 }
 0x10f   :  { %v623_v34 = vadd.f32 %v594_v19, %v310_v20  ;;  %v624_v49 = vadd.f32 %v607_v41, %v339_v39 }
 0x111   :  { %v1634_v44 = vmul.f32 -1.442695, %v623_v34  ;;  %v1635_v59 = vmul.f32 -1.442695, %v624_v49 }
 0x113   :  { %v2230_v7 = vpop.f32.mrf.mxu2  ;;  %1751 = vpow2.f32 %v1634_v44 }
 0x114   :  { %v311_v9 = vpop.f32.mrf.mxu0  ;;  %v340_v12 = vpop.f32.mrf.mxu1  ;;  %1753 = vpow2.f32 %v1635_v59 }
 0x115   :  { %v2236_v15 = vadd.f32 %v311_v9, %v2226_v5  ;;  %v2239_v16 = vadd.f32 %v340_v12, %v2228_v6 }
 0x119   :  { %v1752_v61 = vpop.eup %1751 }
 0x11a   :  { %v631_v3 = vadd.f32 1.0, %v1752_v61  ;;  %v1754_v9 = vpop.eup %1753 }
 0x11b   :  { %v369_v23 = vpop.f32.mrf.mxu2 }
 0x11c   :  { %v2249_v29 = vadd.f32 %v369_v23, %v2243_v21  ;;  %v314_v30 = vpop.f32.mrf.mxu0  ;;  %v343_v31 = vpop.f32.mrf.mxu1  ;;  %1755 = vrcp.f32 %v631_v3  ;;  %vm638_vm13 = vweird.f32 %v631_v3 }
 0x11d   :  { %v2252_v35 = vadd.f32 %v314_v30, %v2226_v5  ;;  %v2255_v38 = vadd.f32 %v343_v31, %v2228_v6  ;;  %v632_v30 = vadd.f32 1.0, %v1754_v9 }
 0x11f   :  { %1757 = vrcp.f32 %v632_v30  ;;  %vm653_vm1 = vweird.f32 %v632_v30 }
 0x122   :  { %v1756_v39 = vpop.eup %1755 }
 0x123   :  { %v372_v47 = vpop.f32.mrf.mxu2  ;;  %v634_v44 = vmul.f32 %v1756_v39, %v631_v3  ;;  %vm639_vm12 = vweird.f32 %v1756_v39 }
 0x124   :  { %v2260_v51 = vadd.f32 %v372_v47, %v2243_v21  ;;  %v316_v52 = vpop.f32.mrf.mxu0  ;;  %v345_v54 = vpop.f32.mrf.mxu1  ;;  %vm640_vm14 = vmor %vm638_vm13, %vm639_vm12 }
 0x125   :  { %v2263_v56 = vadd.f32 %v316_v52, %v2226_v5  ;;  %v2266_v58 = vadd.f32 %v345_v54, %v2228_v6  ;;  %v1758_v61 = vpop.eup %1757 }
 0x126   :  { %vm654_vm0 = vweird.f32 %v1758_v61 }
 0x127   :  { %vm655_vm2 = vmor %vm653_vm1, %vm654_vm0 }
 0x12b   :  { %v374_v62 = vpop.f32.mrf.mxu2 }
 0x12c   :  { %v2269_v63 = vadd.f32 %v374_v62, %v2243_v21  ;;  %v319_v0 = vpop.f32.mrf.mxu0  ;;  %v348_v1 = vpop.f32.mrf.mxu1  ;;  %v635_v62 = vsub.f32 1.0, %v634_v44 }
 0x12d   :  { %v2272_v2 = vadd.f32 %v319_v0, %v2226_v5  ;;  %v2275_v32 = vadd.f32 %v348_v1, %v2228_v6  ;;  %v649_v0 = vmul.f32 %v1758_v61, %v632_v30 }
 0x12e   :  { %v636_v9 = vmul.f32 %v1756_v39, %v635_v62 }
 0x133   :  { %v377_v12 = vpop.f32.mrf.mxu2 }
 0x134   :  { %v2278_v19 = vadd.f32 %v377_v12, %v2243_v21  ;;  %v321_v20 = vpop.f32.mrf.mxu0  ;;  %v350_v23 = vpop.f32.mrf.mxu1 }
 0x135   :  { %v2281_v31 = vadd.f32 %v321_v20, %v2226_v5  ;;  %v2284_v34 = vadd.f32 %v350_v23, %v2228_v6 }
 0x13b   :  { %v379_v41 = vpop.f32.mrf.mxu2 }
 0x13c   :  { %v2287_v47 = vadd.f32 %v379_v41, %v2243_v21  ;;  %v324_v49 = vpop.f32.mrf.mxu0  ;;  %v353_v52 = vpop.f32.mrf.mxu1  ;;  %v650_v41 = vsub.f32 1.0, %v649_v0  ;;  %v368_v0 = vadd.f32 %v2230_v7, %v2243_v21 }
 0x13d   :  { %v2290_v54 = vadd.f32 %v324_v49, %v2226_v5  ;;  %v2293_v59 = vadd.f32 %v353_v52, %v2228_v6  ;;  %v644_v49 = vand.u32 2147483648, %v631_v3  ;;  %v642_v52 = vand.u32 2147483647, %v631_v3 }
 0x13e   :  { %2535 = vst [vmem:[#allocation17_spill] sm:$0xff] %v2287_v47  ;;  %v637_v47 = vadd.f32 %v1756_v39, %v636_v9  ;;  %v651_v44 = vmul.f32 %v1758_v61, %v650_v41 }
 0x13f   :  { %2536 = vst [vmem:[#allocation18_spill] sm:$0xff] %v2290_v54  ;;  %v2302_v54 = vperm.slane %v2224_v4, 2  ;;  %vm643_vm15 = vcmp.eq.f32.partialorder %v642_v52, 8.507059e+37  ;;  %v657_v4 = vand.u32 2147483647, %v632_v30 }
 0x140   :  { %2537 = vst [vmem:[#allocation19_spill] sm:$0xff] %v2293_v59  ;;  %v641_v6 = vsel %vm640_vm14, %v1756_v39, %v637_v47  ;;  %v645_v59 = vor.u32 1.1754944e-38, %v644_v49 }
 0x141   :  { %vm658_vm3 = vcmp.eq.f32.partialorder %v657_v4, 8.507059e+37 }
 0x143   :  { %v382_v1 = vpop.f32.mrf.mxu2 }
 0x144   :  { %v2296_v12 = vadd.f32 %v382_v1, %v2243_v21  ;;  %v326_v20 = vpop.f32.mrf.mxu0 }
 0x145   :  { %v2299_v23 = vadd.f32 %v326_v20, %v2226_v5  ;;  %v652_v5 = vadd.f32 %v1758_v61, %v651_v44  ;;  %v659_v20 = vand.u32 2147483648, %v632_v30 }
 0x146   :  { %2538 = vst [vmem:[#allocation20_spill] sm:$0xff] %v2296_v12  ;;  %v646_v12 = vsel %vm643_vm15, %v645_v59, %v641_v6 }
 0x147   :  { %2539 = vst [vmem:[#allocation21_spill] sm:$0xff] %v2299_v23  ;;  %v656_v3 = vsel %vm655_vm2, %v1758_v61, %v652_v5  ;;  %v660_v39 = vor.u32 1.1754944e-38, %v659_v20 }
 0x149   :  { %v661_v41 = vsel %vm658_vm3, %v660_v39, %v656_v3 }
 0x14a   :  { %v666_v49 = vsub.f32 1.0, %v661_v41  ;;  %v668_v59 = vmul.f32 %v661_v41, %v2074_v26  ;;  %v2336_v26 = vpop.f32.mrf.mxu1 }
 0x14b   :  { %v2338_v30 = vpop.f32.mrf.mxu2 }
 0x14c   :  { %v619_v62 = vpop.f32.mrf.mxu0 }
 0x14d   :  { %v620_v1 = vadd.f32 %v619_v62, %v2302_v54 }
 0x14f   :  { %v663_v9 = vmul.f32 %v646_v12, %v620_v1 }
 0x151   :  { %v664_v23 = vadd.f32 %v663_v9, %v368_v0 }
 0x153   :  { %1759 = vtanh.f32 %v664_v23 }
 0x154   :  { %v621_v47 = vpop.f32.mrf.mxu0 }
 0x159   :  { %v1760_v52 = vpop.eup %1759 }
 0x15a   :  { %v667_v6 = vmul.f32 %v1760_v52, %v666_v49 }
 0x15c   :  { %v2308_v44 = vadd.f32 %v668_v59, %v667_v6 }
 0x15e   :  { %v673_v7 = vpack.c.bf16 %v2308_v44, %v2308_v44 }
 0x160   :  { %682 = vmatmul.bf16.vlgmr.msrb.gmra.mxu1 %v673_v7  ;;  %695 = vmatmul.bf16.vlgmr.msrb.gmra.mxu2 %v673_v7 }
 0x161   :  { %708 = vmatmul.bf16.vlgmr.msra.gmra.mxu3 %v673_v7  ;;  %880 = vmatpush.bf16.msrb.mxu1 %v2109_v14 }
 0x162   :  { %944 = vmatpush.bf16.msrb.mxu2 %v2036_v8  ;;  %957 = vmatpush.bf16.msra.mxu3 %v2076_v28 }
 0x165   :  { %881 = vmatpush.bf16.msrb.mxu1 %v2117_v18 }
 0x166   :  { %945 = vmatpush.bf16.msrb.mxu2 %v2045_v11  ;;  %958 = vmatpush.bf16.msra.mxu3 %v2084_v33 }
 0x169   :  { %882 = vmatpush.bf16.msrb.mxu1 %v2125_v22 }
 0x16a   :  { %946 = vmatpush.bf16.msrb.mxu2 %v2051_v17  ;;  %959 = vmatpush.bf16.msra.mxu3 %v2088_v37 }
 0x16d   :  { %883 = vmatpush.bf16.msrb.mxu1 %v2130_v27 }
 0x16e   :  { %947 = vmatpush.bf16.msrb.mxu2 %v2060_v36  ;;  %960 = vmatpush.bf16.msra.mxu3 %v2091_v40 }
 0x171   :  { %884 = vmatpush.bf16.msrb.mxu1 %v2147_v42 }
 0x172   :  { %948 = vmatpush.bf16.msrb.mxu2 %v2063_v48  ;;  %961 = vmatpush.bf16.msra.mxu3 %v2094_v43 }
 0x175   :  { %885 = vmatpush.bf16.msrb.mxu1 %v2151_v45 }
 0x176   :  { %949 = vmatpush.bf16.msrb.mxu2 %v2066_v60  ;;  %962 = vmatpush.bf16.msra.mxu3 %v2097_v46 }
 0x179   :  { %886 = vmatpush.bf16.msrb.mxu1 %v2168_v55 }
 0x17a   :  { %950 = vmatpush.bf16.msrb.mxu2 %v2069_v10  ;;  %963 = vmatpush.bf16.msra.mxu3 %v2100_v50 }
 0x17d   :  { %887 = vmatpush.bf16.msrb.mxu1 %v2172_v57 }
 0x17e   :  { %951 = vmatpush.bf16.msrb.mxu2 %v2072_v25  ;;  %964 = vmatpush.bf16.msra.mxu3 %v2103_v53 }
 0x1dd   :  { %v683_v61 = vpop.f32.mrf.mxu1 }
 0x1de   :  { %v684_v12 = vadd.f32 %v683_v61, %v2233_v13 }
 0x1e0   :  { %v713_v23 = vadd.f32 %v684_v12, %v2236_v15 }
 0x1e2   :  { %v1636_v62 = vmul.f32 -1.442695, %v713_v23 }
 0x1e3   :  { %v696_v1 = vpop.f32.mrf.mxu2 }
 0x1e4   :  { %1761 = vpow2.f32 %v1636_v62  ;;  %v697_v5 = vadd.f32 %v696_v1, %v2246_v24  ;;  %v709_v0 = vpop.f32.mrf.mxu3 }
 0x1e5   :  { %v685_v9 = vpop.f32.mrf.mxu1 }
 0x1e6   :  { %v714_v20 = vadd.f32 %v697_v5, %v2239_v16  ;;  %v710_v9 = vadd.f32 %v709_v0, %v2302_v54 }
 0x1e8   :  { %v1637_v4 = vmul.f32 -1.442695, %v714_v20 }
 0x1ea   :  { %v1762_v3 = vpop.eup %1761  ;;  %1763 = vpow2.f32 %v1637_v4 }
 0x1eb   :  { %v721_v39 = vadd.f32 1.0, %v1762_v3  ;;  %v698_v47 = vpop.f32.mrf.mxu2 }
 0x1ec   :  { %v711_v41 = vpop.f32.mrf.mxu3 }
 0x1ed   :  { %1765 = vrcp.f32 %v721_v39  ;;  %v734_v7 = vand.u32 2147483648, %v721_v39  ;;  %v732_v12 = vand.u32 2147483647, %v721_v39  ;;  %vm728_vm5 = vweird.f32 %v721_v39 }
 0x1ef   :  { %v735_v1 = vor.u32 1.1754944e-38, %v734_v7  ;;  %vm733_vm7 = vcmp.eq.f32.partialorder %v732_v12, 8.507059e+37 }
 0x1f0   :  { %v1764_v49 = vpop.eup %1763 }
 0x1f1   :  { %v722_v52 = vadd.f32 1.0, %v1764_v49 }
 0x1f3   :  { %v1766_v6 = vpop.eup %1765  ;;  %1767 = vrcp.f32 %v722_v52  ;;  %v749_v41 = vand.u32 2147483648, %v722_v52  ;;  %v747_v49 = vand.u32 2147483647, %v722_v52  ;;  %vm743_vm9 = vweird.f32 %v722_v52 }
 0x1f4   :  { %v724_v15 = vmul.f32 %v1766_v6, %v721_v39  ;;  %vm729_vm4 = vweird.f32 %v1766_v6 }
 0x1f5   :  { %vm730_vm6 = vmor %vm728_vm5, %vm729_vm4  ;;  %vm748_vm11 = vcmp.eq.f32.partialorder %v747_v49, 8.507059e+37 }
 0x1f6   :  { %v725_v59 = vsub.f32 1.0, %v724_v15 }
 0x1f8   :  { %v726_v61 = vmul.f32 %v1766_v6, %v725_v59 }
 0x1f9   :  { %v1768_v23 = vpop.eup %1767 }
 0x1fa   :  { %v739_v62 = vmul.f32 %v1768_v23, %v722_v52  ;;  %v727_v16 = vadd.f32 %v1766_v6, %v726_v61  ;;  %vm744_vm8 = vweird.f32 %v1768_v23  ;;  %v750_v61 = vor.u32 1.1754944e-38, %v749_v41 }
 0x1fb   :  { %vm745_vm10 = vmor %vm743_vm9, %vm744_vm8 }
 0x1fc   :  { %v740_v5 = vsub.f32 1.0, %v739_v62  ;;  %v731_v20 = vsel %vm730_vm6, %v1766_v6, %v727_v16 }
 0x1fd   :  { %v736_v4 = vsel %vm733_vm7, %v735_v1, %v731_v20 }
 0x1fe   :  { %v741_v3 = vmul.f32 %v1768_v23, %v740_v5  ;;  %v753_v47 = vmul.f32 %v736_v4, %v710_v9 }
 0x200   :  { %v754_v15 = vadd.f32 %v753_v47, %v2249_v29  ;;  %v742_v59 = vadd.f32 %v1768_v23, %v741_v3 }
 0x202   :  { %1769 = vtanh.f32 %v754_v15  ;;  %v746_v39 = vsel %vm745_vm10, %v1768_v23, %v742_v59 }
 0x203   :  { %v751_v7 = vsel %vm748_vm11, %v750_v61, %v746_v39 }
 0x204   :  { %v756_v62 = vsub.f32 1.0, %v751_v7  ;;  %v758_v12 = vmul.f32 %v751_v7, %v2308_v44 }
 0x208   :  { %v1770_v0 = vpop.eup %1769 }
 0x209   :  { %v757_v6 = vmul.f32 %v1770_v0, %v756_v62 }
 0x20b   :  { %v2347_v16 = vadd.f32 %v758_v12, %v757_v6 }
 0x20d   :  { %v763_v1 = vpack.c.bf16 %v2347_v16, %v2347_v16 }
 0x20f   :  { %772 = vmatmul.bf16.vlgmr.msra.gmra.mxu0 %v763_v1  ;;  %785 = vmatmul.bf16.vlgmr.msra.gmra.mxu1 %v763_v1 }
 0x210   :  { %798 = vmatmul.bf16.vlgmr.msra.gmra.mxu2 %v763_v1  ;;  %970 = vmatpush.bf16.msra.mxu0 %v2109_v14 }
 0x211   :  { %1034 = vmatpush.bf16.msra.mxu1 %v2036_v8  ;;  %1047 = vmatpush.bf16.msra.mxu2 %v2076_v28 }
 0x214   :  { %971 = vmatpush.bf16.msra.mxu0 %v2117_v18 }
 0x215   :  { %1035 = vmatpush.bf16.msra.mxu1 %v2045_v11  ;;  %1048 = vmatpush.bf16.msra.mxu2 %v2084_v33 }
 0x218   :  { %972 = vmatpush.bf16.msra.mxu0 %v2125_v22 }
 0x219   :  { %1036 = vmatpush.bf16.msra.mxu1 %v2051_v17  ;;  %1049 = vmatpush.bf16.msra.mxu2 %v2088_v37 }
 0x21c   :  { %973 = vmatpush.bf16.msra.mxu0 %v2130_v27 }
 0x21d   :  { %1037 = vmatpush.bf16.msra.mxu1 %v2060_v36  ;;  %1050 = vmatpush.bf16.msra.mxu2 %v2091_v40 }
 0x220   :  { %974 = vmatpush.bf16.msra.mxu0 %v2147_v42 }
 0x221   :  { %1038 = vmatpush.bf16.msra.mxu1 %v2063_v48  ;;  %1051 = vmatpush.bf16.msra.mxu2 %v2094_v43 }
 0x224   :  { %975 = vmatpush.bf16.msra.mxu0 %v2151_v45 }
 0x225   :  { %1039 = vmatpush.bf16.msra.mxu1 %v2066_v60  ;;  %1052 = vmatpush.bf16.msra.mxu2 %v2097_v46 }
 0x228   :  { %976 = vmatpush.bf16.msra.mxu0 %v2168_v55 }
 0x229   :  { %1040 = vmatpush.bf16.msra.mxu1 %v2069_v10  ;;  %1053 = vmatpush.bf16.msra.mxu2 %v2100_v50 }
 0x22c   :  { %977 = vmatpush.bf16.msra.mxu0 %v2172_v57 }
 0x22d   :  { %1041 = vmatpush.bf16.msra.mxu1 %v2072_v25  ;;  %1054 = vmatpush.bf16.msra.mxu2 %v2103_v53 }
 0x28c   :  { %v773_v29 = vpop.f32.mrf.mxu0  ;;  %v786_v44 = vpop.f32.mrf.mxu1 }
 0x28d   :  { %v774_v52 = vadd.f32 %v773_v29, %v2233_v13  ;;  %v787_v23 = vadd.f32 %v786_v44, %v2246_v24 }
 0x28f   :  { %v803_v5 = vadd.f32 %v774_v52, %v2252_v35  ;;  %v804_v9 = vadd.f32 %v787_v23, %v2255_v38 }
 0x291   :  { %v1638_v20 = vmul.f32 -1.442695, %v803_v5  ;;  %v1639_v4 = vmul.f32 -1.442695, %v804_v9 }
 0x293   :  { %1771 = vpow2.f32 %v1638_v20  ;;  %v799_v3 = vpop.f32.mrf.mxu2 }
 0x294   :  { %1773 = vpow2.f32 %v1639_v4  ;;  %v775_v47 = vpop.f32.mrf.mxu0  ;;  %v788_v41 = vpop.f32.mrf.mxu1  ;;  %v800_v5 = vadd.f32 %v799_v3, %v2302_v54 }
 0x299   :  { %v1772_v49 = vpop.eup %1771 }
 0x29a   :  { %v1774_v15 = vpop.eup %1773  ;;  %v811_v59 = vadd.f32 1.0, %v1772_v49 }
 0x29b   :  { %v812_v39 = vadd.f32 1.0, %v1774_v15  ;;  %v801_v61 = vpop.f32.mrf.mxu2 }
 0x29c   :  { %1775 = vrcp.f32 %v811_v59  ;;  %v824_v12 = vand.u32 2147483648, %v811_v59  ;;  %v822_v29 = vand.u32 2147483647, %v811_v59  ;;  %vm818_vm13 = vweird.f32 %v811_v59 }
 0x29d   :  { %1777 = vrcp.f32 %v812_v39  ;;  %v839_v41 = vand.u32 2147483648, %v812_v39  ;;  %vm833_vm1 = vweird.f32 %v812_v39  ;;  %v837_v49 = vand.u32 2147483647, %v812_v39 }
 0x29e   :  { %v825_v23 = vor.u32 1.1754944e-38, %v824_v12  ;;  %vm823_vm15 = vcmp.eq.f32.partialorder %v822_v29, 8.507059e+37 }
 0x29f   :  { %vm838_vm3 = vcmp.eq.f32.partialorder %v837_v49, 8.507059e+37 }
 0x2a2   :  { %v1776_v7 = vpop.eup %1775 }
 0x2a3   :  { %v1778_v62 = vpop.eup %1777  ;;  %v814_v0 = vmul.f32 %v1776_v7, %v811_v59  ;;  %vm819_vm12 = vweird.f32 %v1776_v7 }
 0x2a4   :  { %v829_v35 = vmul.f32 %v1778_v62, %v812_v39  ;;  %vm820_vm14 = vmor %vm818_vm13, %vm819_vm12  ;;  %vm834_vm0 = vweird.f32 %v1778_v62 }
 0x2a5   :  { %v815_v6 = vsub.f32 1.0, %v814_v0  ;;  %vm835_vm2 = vmor %vm833_vm1, %vm834_vm0  ;;  %v840_v0 = vor.u32 1.1754944e-38, %v839_v41 }
 0x2a6   :  { %v830_v38 = vsub.f32 1.0, %v829_v35 }
 0x2a7   :  { %v816_v1 = vmul.f32 %v1776_v7, %v815_v6 }
 0x2a8   :  { %v831_v44 = vmul.f32 %v1778_v62, %v830_v38 }
 0x2a9   :  { %v817_v52 = vadd.f32 %v1776_v7, %v816_v1 }
 0x2aa   :  { %v832_v4 = vadd.f32 %v1778_v62, %v831_v44 }
 0x2ab   :  { %v821_v9 = vsel %vm820_vm14, %v1776_v7, %v817_v52 }
 0x2ac   :  { %v826_v20 = vsel %vm823_vm15, %v825_v23, %v821_v9  ;;  %v836_v61 = vsel %vm835_vm2, %v1778_v62, %v832_v4 }
 0x2ad   :  { %v843_v47 = vmul.f32 %v826_v20, %v800_v5  ;;  %v841_v59 = vsel %vm838_vm3, %v840_v0, %v836_v61 }
 0x2ae   :  { %v846_v35 = vsub.f32 1.0, %v841_v59  ;;  %v848_v7 = vmul.f32 %v841_v59, %v2347_v16 }
 0x2af   :  { %v844_v15 = vadd.f32 %v843_v47, %v2260_v51 }
 0x2b1   :  { %1779 = vtanh.f32 %v844_v15 }
 0x2b7   :  { %v1780_v6 = vpop.eup %1779 }
 0x2b8   :  { %v847_v3 = vmul.f32 %v1780_v6, %v846_v35 }
 0x2ba   :  { %v2382_v38 = vadd.f32 %v848_v7, %v847_v3 }
 0x2bc   :  { %v853_v12 = vpack.c.bf16 %v2382_v38, %v2382_v38 }
 0x2be   :  { %862 = vmatmul.bf16.vlgmr.msrb.gmra.mxu3 %v853_v12  ;;  %875 = vmatmul.bf16.vlgmr.msrb.gmra.mxu0 %v853_v12 }
 0x2bf   :  { %888 = vmatmul.bf16.vlgmr.msrb.gmra.mxu1 %v853_v12  ;;  %1060 = vmatpush.bf16.msrb.mxu3 %v2109_v14 }
 0x2c0   :  { %1124 = vmatpush.bf16.msrb.mxu0 %v2036_v8  ;;  %1137 = vmatpush.bf16.msrb.mxu1 %v2076_v28 }
 0x2c3   :  { %1061 = vmatpush.bf16.msrb.mxu3 %v2117_v18 }
 0x2c4   :  { %1125 = vmatpush.bf16.msrb.mxu0 %v2045_v11  ;;  %1138 = vmatpush.bf16.msrb.mxu1 %v2084_v33 }
 0x2c7   :  { %1062 = vmatpush.bf16.msrb.mxu3 %v2125_v22 }
 0x2c8   :  { %1126 = vmatpush.bf16.msrb.mxu0 %v2051_v17  ;;  %1139 = vmatpush.bf16.msrb.mxu1 %v2088_v37 }
 0x2cb   :  { %1063 = vmatpush.bf16.msrb.mxu3 %v2130_v27 }
 0x2cc   :  { %1127 = vmatpush.bf16.msrb.mxu0 %v2060_v36  ;;  %1140 = vmatpush.bf16.msrb.mxu1 %v2091_v40 }
 0x2cf   :  { %1064 = vmatpush.bf16.msrb.mxu3 %v2147_v42 }
 0x2d0   :  { %1128 = vmatpush.bf16.msrb.mxu0 %v2063_v48  ;;  %1141 = vmatpush.bf16.msrb.mxu1 %v2094_v43 }
 0x2d3   :  { %1065 = vmatpush.bf16.msrb.mxu3 %v2151_v45 }
 0x2d4   :  { %1129 = vmatpush.bf16.msrb.mxu0 %v2066_v60  ;;  %1142 = vmatpush.bf16.msrb.mxu1 %v2097_v46 }
 0x2d7   :  { %1066 = vmatpush.bf16.msrb.mxu3 %v2168_v55 }
 0x2d8   :  { %1130 = vmatpush.bf16.msrb.mxu0 %v2069_v10  ;;  %1143 = vmatpush.bf16.msrb.mxu1 %v2100_v50 }
 0x2db   :  { %1067 = vmatpush.bf16.msrb.mxu3 %v2172_v57 }
 0x2dc   :  { %1131 = vmatpush.bf16.msrb.mxu0 %v2072_v25  ;;  %1144 = vmatpush.bf16.msrb.mxu1 %v2103_v53 }
 0x33b   :  { %v876_v51 = vpop.f32.mrf.mxu0 }
 0x33c   :  { %v877_v16 = vadd.f32 %v876_v51, %v2246_v24  ;;  %v889_v39 = vpop.f32.mrf.mxu1 }
 0x33e   :  { %v894_v62 = vadd.f32 %v877_v16, %v2266_v58  ;;  %v890_v16 = vadd.f32 %v889_v39, %v2302_v54 }
 0x340   :  { %v1641_v1 = vmul.f32 -1.442695, %v894_v62 }
 0x341   :  { %v863_v29 = vpop.f32.mrf.mxu3 }
 0x342   :  { %1781 = vpow2.f32 %v1641_v1  ;;  %v864_v44 = vadd.f32 %v863_v29, %v2233_v13 }
 0x343   :  { %v878_v52 = vpop.f32.mrf.mxu0 }
 0x344   :  { %v893_v23 = vadd.f32 %v864_v44, %v2263_v56  ;;  %v891_v5 = vpop.f32.mrf.mxu1 }
 0x346   :  { %v1640_v9 = vmul.f32 -1.442695, %v893_v23 }
 0x348   :  { %v1782_v20 = vpop.eup %1781  ;;  %1783 = vpow2.f32 %v1640_v9 }
 0x349   :  { %v902_v4 = vadd.f32 1.0, %v1782_v20  ;;  %v865_v47 = vpop.f32.mrf.mxu3 }
 0x34b   :  { %1785 = vrcp.f32 %v902_v4  ;;  %v929_v44 = vand.u32 2147483648, %v902_v4  ;;  %vm923_vm9 = vweird.f32 %v902_v4  ;;  %v927_v23 = vand.u32 2147483647, %v902_v4 }
 0x34d   :  { %v930_v20 = vor.u32 1.1754944e-38, %v929_v44  ;;  %vm928_vm11 = vcmp.eq.f32.partialorder %v927_v23, 8.507059e+37 }
 0x34e   :  { %v1784_v41 = vpop.eup %1783 }
 0x34f   :  { %v901_v49 = vadd.f32 1.0, %v1784_v41 }
 0x351   :  { %1787 = vrcp.f32 %v901_v49  ;;  %v1786_v15 = vpop.eup %1785  ;;  %v914_v6 = vand.u32 2147483648, %v901_v49  ;;  %v912_v56 = vand.u32 2147483647, %v901_v49  ;;  %vm908_vm5 = vweird.f32 %v901_v49 }
 0x352   :  { %v919_v58 = vmul.f32 %v1786_v15, %v902_v4  ;;  %vm924_vm8 = vweird.f32 %v1786_v15 }
 0x353   :  { %v915_v51 = vor.u32 1.1754944e-38, %v914_v6  ;;  %vm913_vm7 = vcmp.eq.f32.partialorder %v912_v56, 8.507059e+37  ;;  %vm925_vm10 = vmor %vm923_vm9, %vm924_vm8 }
 0x354   :  { %v920_v59 = vsub.f32 1.0, %v919_v58 }
 0x356   :  { %v921_v7 = vmul.f32 %v1786_v15, %v920_v59 }
 0x357   :  { %v1788_v61 = vpop.eup %1787 }
 0x358   :  { %v904_v0 = vmul.f32 %v1788_v61, %v901_v49  ;;  %vm909_vm4 = vweird.f32 %v1788_v61  ;;  %v922_v29 = vadd.f32 %v1786_v15, %v921_v7 }
 0x359   :  { %vm910_vm6 = vmor %vm908_vm5, %vm909_vm4 }
 0x35a   :  { %v905_v35 = vsub.f32 1.0, %v904_v0  ;;  %v926_v9 = vsel %vm925_vm10, %v1786_v15, %v922_v29 }
 0x35b   :  { %v931_v47 = vsel %vm928_vm11, %v930_v20, %v926_v9 }
 0x35c   :  { %v906_v3 = vmul.f32 %v1788_v61, %v905_v35  ;;  %v936_v41 = vsub.f32 1.0, %v931_v47  ;;  %v938_v58 = vmul.f32 %v931_v47, %v2382_v38 }
 0x35e   :  { %v907_v12 = vadd.f32 %v1788_v61, %v906_v3 }
 0x360   :  { %v911_v62 = vsel %vm910_vm6, %v1788_v61, %v907_v12 }
 0x361   :  { %v916_v1 = vsel %vm913_vm7, %v915_v51, %v911_v62 }
 0x362   :  { %v933_v52 = vmul.f32 %v916_v1, %v890_v16 }
 0x364   :  { %v934_v5 = vadd.f32 %v933_v52, %v2269_v63 }
 0x366   :  { %1789 = vtanh.f32 %v934_v5 }
 0x36c   :  { %v1790_v49 = vpop.eup %1789 }
 0x36d   :  { %v937_v39 = vmul.f32 %v1790_v49, %v936_v41 }
 0x36f   :  { %v2417_v61 = vadd.f32 %v938_v58, %v937_v39 }
 0x371   :  { %v943_v0 = vpack.c.bf16 %v2417_v61, %v2417_v61 }
 0x373   :  { %952 = vmatmul.bf16.vlgmr.msrb.gmra.mxu2 %v943_v0  ;;  %965 = vmatmul.bf16.vlgmr.msra.gmra.mxu3 %v943_v0 }
 0x374   :  { %978 = vmatmul.bf16.vlgmr.msra.gmra.mxu0 %v943_v0  ;;  %1150 = vmatpush.bf16.msrb.mxu2 %v2109_v14 }
 0x375   :  { %1214 = vmatpush.bf16.msra.mxu3 %v2036_v8  ;;  %1227 = vmatpush.bf16.msra.mxu0 %v2076_v28 }
 0x378   :  { %1151 = vmatpush.bf16.msrb.mxu2 %v2117_v18 }
 0x379   :  { %1215 = vmatpush.bf16.msra.mxu3 %v2045_v11  ;;  %1228 = vmatpush.bf16.msra.mxu0 %v2084_v33 }
 0x37c   :  { %1152 = vmatpush.bf16.msrb.mxu2 %v2125_v22 }
 0x37d   :  { %1216 = vmatpush.bf16.msra.mxu3 %v2051_v17  ;;  %1229 = vmatpush.bf16.msra.mxu0 %v2088_v37 }
 0x380   :  { %1153 = vmatpush.bf16.msrb.mxu2 %v2130_v27 }
 0x381   :  { %1217 = vmatpush.bf16.msra.mxu3 %v2060_v36  ;;  %1230 = vmatpush.bf16.msra.mxu0 %v2091_v40 }
 0x384   :  { %1154 = vmatpush.bf16.msrb.mxu2 %v2147_v42 }
 0x385   :  { %1218 = vmatpush.bf16.msra.mxu3 %v2063_v48  ;;  %1231 = vmatpush.bf16.msra.mxu0 %v2094_v43 }
 0x388   :  { %1155 = vmatpush.bf16.msrb.mxu2 %v2151_v45 }
 0x389   :  { %1219 = vmatpush.bf16.msra.mxu3 %v2066_v60  ;;  %1232 = vmatpush.bf16.msra.mxu0 %v2097_v46 }
 0x38c   :  { %1156 = vmatpush.bf16.msrb.mxu2 %v2168_v55 }
 0x38d   :  { %1220 = vmatpush.bf16.msra.mxu3 %v2069_v10  ;;  %1233 = vmatpush.bf16.msra.mxu0 %v2100_v50 }
 0x390   :  { %1157 = vmatpush.bf16.msrb.mxu2 %v2172_v57 }
 0x391   :  { %1221 = vmatpush.bf16.msra.mxu3 %v2072_v25  ;;  %1234 = vmatpush.bf16.msra.mxu0 %v2103_v53 }
 0x3f1   :  { %v979_v8 = vpop.f32.mrf.mxu0 }
 0x3f2   :  { %v980_v12 = vadd.f32 %v979_v8, %v2302_v54 }
 0x3f6   :  { %v953_v11 = vpop.f32.mrf.mxu2  ;;  %v966_v17 = vpop.f32.mrf.mxu3 }
 0x3f7   :  { %v954_v36 = vadd.f32 %v953_v11, %v2233_v13  ;;  %v967_v48 = vadd.f32 %v966_v17, %v2246_v24 }
 0x3f9   :  { %v983_v60 = vadd.f32 %v954_v36, %v2272_v2  ;;  %v984_v28 = vadd.f32 %v967_v48, %v2275_v32  ;;  %v981_v10 = vpop.f32.mrf.mxu0 }
 0x3fb   :  { %v1642_v33 = vmul.f32 -1.442695, %v983_v60  ;;  %v1643_v37 = vmul.f32 -1.442695, %v984_v28 }
 0x3fd   :  { %1791 = vpow2.f32 %v1642_v33 }
 0x3fe   :  { %1793 = vpow2.f32 %v1643_v37  ;;  %v955_v40 = vpop.f32.mrf.mxu2  ;;  %v968_v25 = vpop.f32.mrf.mxu3 }
 0x403   :  { %v1792_v43 = vpop.eup %1791 }
 0x404   :  { %v1794_v46 = vpop.eup %1793  ;;  %v991_v50 = vadd.f32 1.0, %v1792_v43 }
 0x405   :  { %v992_v53 = vadd.f32 1.0, %v1794_v46 }
 0x406   :  { %1795 = vrcp.f32 %v991_v50  ;;  %v1004_v59 = vand.u32 2147483648, %v991_v50  ;;  %v1002_v6 = vand.u32 2147483647, %v991_v50  ;;  %vm998_vm13 = vweird.f32 %v991_v50 }
 0x407   :  { %1797 = vrcp.f32 %v992_v53  ;;  %v1019_v1 = vand.u32 2147483648, %v992_v53  ;;  %vm1013_vm1 = vweird.f32 %v992_v53  ;;  %v1017_v44 = vand.u32 2147483647, %v992_v53 }
 0x408   :  { %v1005_v7 = vor.u32 1.1754944e-38, %v1004_v59  ;;  %vm1003_vm15 = vcmp.eq.f32.partialorder %v1002_v6, 8.507059e+37  ;;  %v2540_v59 = vld [vmem:[#allocation17_spill] sm:$0xff] }
 0x409   :  { %v1020_v5 = vor.u32 1.1754944e-38, %v1019_v1  ;;  %vm1018_vm3 = vcmp.eq.f32.partialorder %v1017_v44, 8.507059e+37 }
 0x40c   :  { %v1796_v63 = vpop.eup %1795 }
 0x40d   :  { %v1798_v38 = vpop.eup %1797  ;;  %v994_v4 = vmul.f32 %v1796_v63, %v991_v50  ;;  %vm999_vm12 = vweird.f32 %v1796_v63 }
 0x40e   :  { %v1009_v15 = vmul.f32 %v1798_v38, %v992_v53  ;;  %vm1000_vm14 = vmor %vm998_vm13, %vm999_vm12  ;;  %vm1014_vm0 = vweird.f32 %v1798_v38 }
 0x40f   :  { %v995_v2 = vsub.f32 1.0, %v994_v4  ;;  %vm1015_vm2 = vmor %vm1013_vm1, %vm1014_vm0 }
 0x410   :  { %v1010_v32 = vsub.f32 1.0, %v1009_v15 }
 0x411   :  { %v996_v35 = vmul.f32 %v1796_v63, %v995_v2 }
 0x412   :  { %v1011_v3 = vmul.f32 %v1798_v38, %v1010_v32 }
 0x413   :  { %v997_v56 = vadd.f32 %v1796_v63, %v996_v35 }
 0x414   :  { %v1012_v62 = vadd.f32 %v1798_v38, %v1011_v3 }
 0x415   :  { %v1001_v51 = vsel %vm1000_vm14, %v1796_v63, %v997_v56 }
 0x416   :  { %v1006_v16 = vsel %vm1003_vm15, %v1005_v7, %v1001_v51  ;;  %v1016_v23 = vsel %vm1015_vm2, %v1798_v38, %v1012_v62 }
 0x417   :  { %v1023_v29 = vmul.f32 %v1006_v16, %v980_v12  ;;  %v1021_v9 = vsel %vm1018_vm3, %v1020_v5, %v1016_v23  ;;  %v2541_v5 = vld [vmem:[#allocation18_spill] sm:$0xff] }
 0x418   :  { %v1026_v20 = vsub.f32 1.0, %v1021_v9  ;;  %v1028_v49 = vmul.f32 %v1021_v9, %v2417_v61 }
 0x419   :  { %v1024_v52 = vadd.f32 %v1023_v29, %v2278_v19 }
 0x41b   :  { %1799 = vtanh.f32 %v1024_v52 }
 0x421   :  { %v1800_v47 = vpop.eup %1799 }
 0x422   :  { %v1027_v41 = vmul.f32 %v1800_v47, %v1026_v20  ;;  %v2542_v20 = vld [vmem:[#allocation19_spill] sm:$0xff] }
 0x424   :  { %v2452_v39 = vadd.f32 %v1028_v49, %v1027_v41 }
 0x426   :  { %v1033_v58 = vpack.c.bf16 %v2452_v39, %v2452_v39 }
 0x428   :  { %1042 = vmatmul.bf16.vlgmr.msra.gmra.mxu1 %v1033_v58  ;;  %1055 = vmatmul.bf16.vlgmr.msra.gmra.mxu2 %v1033_v58 }
 0x429   :  { %1068 = vmatmul.bf16.vlgmr.msrb.gmra.mxu3 %v1033_v58  ;;  %1240 = vmatpush.bf16.msra.mxu1 %v2109_v14 }
 0x42d   :  { %1241 = vmatpush.bf16.msra.mxu1 %v2117_v18 }
 0x431   :  { %1242 = vmatpush.bf16.msra.mxu1 %v2125_v22 }
 0x435   :  { %1243 = vmatpush.bf16.msra.mxu1 %v2130_v27 }
 0x439   :  { %1244 = vmatpush.bf16.msra.mxu1 %v2147_v42 }
 0x43d   :  { %1245 = vmatpush.bf16.msra.mxu1 %v2151_v45 }
 0x441   :  { %1246 = vmatpush.bf16.msra.mxu1 %v2168_v55 }
 0x445   :  { %1247 = vmatpush.bf16.msra.mxu1 %v2172_v57 }
 0x4a5   :  { %v1043_v19 = vpop.f32.mrf.mxu1 }
 0x4a6   :  { %v1044_v61 = vadd.f32 %v1043_v19, %v2233_v13 }
 0x4a8   :  { %v1073_v0 = vadd.f32 %v1044_v61, %v2281_v31 }
 0x4aa   :  { %v1644_v14 = vmul.f32 -1.442695, %v1073_v0 }
 0x4ab   :  { %v1056_v8 = vpop.f32.mrf.mxu2 }
 0x4ac   :  { %1801 = vpow2.f32 %v1644_v14  ;;  %v1057_v18 = vadd.f32 %v1056_v8, %v2246_v24  ;;  %v1069_v22 = vpop.f32.mrf.mxu3 }
 0x4ad   :  { %v1045_v27 = vpop.f32.mrf.mxu1  ;;  %v1070_v50 = vadd.f32 %v1069_v22, %v2302_v54 }
 0x4ae   :  { %v1074_v42 = vadd.f32 %v1057_v18, %v2284_v34 }
 0x4b0   :  { %v1645_v11 = vmul.f32 -1.442695, %v1074_v42 }
 0x4b2   :  { %v1802_v45 = vpop.eup %1801  ;;  %1803 = vpow2.f32 %v1645_v11 }
 0x4b3   :  { %v1081_v55 = vadd.f32 1.0, %v1802_v45  ;;  %v1058_v17 = vpop.f32.mrf.mxu2 }
 0x4b4   :  { %v1071_v57 = vpop.f32.mrf.mxu3 }
 0x4b5   :  { %1805 = vrcp.f32 %v1081_v55  ;;  %v1094_v10 = vand.u32 2147483648, %v1081_v55  ;;  %v1092_v37 = vand.u32 2147483647, %v1081_v55  ;;  %vm1088_vm5 = vweird.f32 %v1081_v55 }
 0x4b7   :  { %v1095_v43 = vor.u32 1.1754944e-38, %v1094_v10  ;;  %vm1093_vm7 = vcmp.eq.f32.partialorder %v1092_v37, 8.507059e+37 }
 0x4b8   :  { %v1804_v36 = vpop.eup %1803 }
 0x4b9   :  { %v1082_v48 = vadd.f32 1.0, %v1804_v36 }
 0x4bb   :  { %v1806_v60 = vpop.eup %1805  ;;  %1807 = vrcp.f32 %v1082_v48  ;;  %v1109_v15 = vand.u32 2147483648, %v1082_v48  ;;  %v1107_v2 = vand.u32 2147483647, %v1082_v48  ;;  %vm1103_vm9 = vweird.f32 %v1082_v48 }
 0x4bc   :  { %v1084_v31 = vmul.f32 %v1806_v60, %v1081_v55  ;;  %vm1089_vm4 = vweird.f32 %v1806_v60 }
 0x4bd   :  { %vm1090_vm6 = vmor %vm1088_vm5, %vm1089_vm4  ;;  %v1110_v3 = vor.u32 1.1754944e-38, %v1109_v15  ;;  %vm1108_vm11 = vcmp.eq.f32.partialorder %v1107_v2, 8.507059e+37 }
 0x4be   :  { %v1085_v28 = vsub.f32 1.0, %v1084_v31 }
 0x4c0   :  { %v1086_v33 = vmul.f32 %v1806_v60, %v1085_v28 }
 0x4c1   :  { %v1808_v40 = vpop.eup %1807 }
 0x4c2   :  { %v1099_v25 = vmul.f32 %v1808_v40, %v1082_v48  ;;  %v1087_v34 = vadd.f32 %v1806_v60, %v1086_v33  ;;  %vm1104_vm8 = vweird.f32 %v1808_v40 }
 0x4c3   :  { %vm1105_vm10 = vmor %vm1103_vm9, %vm1104_vm8 }
 0x4c4   :  { %v1100_v46 = vsub.f32 1.0, %v1099_v25  ;;  %v1091_v53 = vsel %vm1090_vm6, %v1806_v60, %v1087_v34 }
 0x4c5   :  { %v1096_v63 = vsel %vm1093_vm7, %v1095_v43, %v1091_v53  ;;  %v2543_v43 = vld [vmem:[#allocation20_spill] sm:$0xff] }
 0x4c6   :  { %v1101_v38 = vmul.f32 %v1808_v40, %v1100_v46  ;;  %v1113_v4 = vmul.f32 %v1096_v63, %v1070_v50 }
 0x4c8   :  { %v1114_v32 = vadd.f32 %v1113_v4, %v2540_v59  ;;  %v1102_v35 = vadd.f32 %v1808_v40, %v1101_v38 }
 0x4ca   :  { %1809 = vtanh.f32 %v1114_v32  ;;  %v1106_v6 = vsel %vm1105_vm10, %v1808_v40, %v1102_v35  ;;  %v1737_v35 = vld [vmem:[%s2529_s6 + $0x38] sm:$0xff] }
 0x4cb   :  { %v1111_v56 = vsel %vm1108_vm11, %v1110_v3, %v1106_v6  ;;  %1370 = vmatpush.bf16.msra.mxu2 %v1737_v35  ;;  %v1736_v6 = vld [vmem:[%s2529_s6 + $0x30] sm:$0xff] }
 0x4cc   :  { %v1116_v7 = vsub.f32 1.0, %v1111_v56  ;;  %v1118_v16 = vmul.f32 %v1111_v56, %v2452_v39  ;;  %v2544_v56 = vld [vmem:[#allocation16_spill] sm:$0xff] }
 0x4cf   :  { %1371 = vmatpush.bf16.msra.mxu2 %v1736_v6 }
 0x4d0   :  { %v1810_v12 = vpop.eup %1809 }
 0x4d1   :  { %v1117_v51 = vmul.f32 %v1810_v12, %v1116_v7  ;;  %v356_v7 = vadd.f32 %v2336_v26, %v2544_v56 }
 0x4d3   :  { %v1119_v62 = vadd.f32 %v1118_v16, %v1117_v51  ;;  %v1735_v16 = vld [vmem:[%s2529_s6 + $0x28] sm:$0xff] }
 0x4d4   :  { %1372 = vmatpush.bf16.msra.mxu2 %v1735_v16 }
 0x4d5   :  { %v1123_v1 = vpack.c.bf16 %v1119_v62, %v1119_v62 }
 0x4d7   :  { %1132 = vmatmul.bf16.vlgmr.msrb.gmra.mxu0 %v1123_v1  ;;  %1145 = vmatmul.bf16.vlgmr.msrb.gmra.mxu1 %v1123_v1 }
 0x4d8   :  { %1158 = vmatmul.bf16.vlgmr.msrb.gmra.mxu2 %v1123_v1 }
 0x554   :  { %v1133_v29 = vpop.f32.mrf.mxu0  ;;  %v1146_v44 = vpop.f32.mrf.mxu1 }
 0x555   :  { %v1134_v52 = vadd.f32 %v1133_v29, %v2233_v13  ;;  %v1147_v23 = vadd.f32 %v1146_v44, %v2246_v24  ;;  %v1734_v29 = vld [vmem:[%s2529_s6 + $0x20] sm:$0xff] }
 0x556   :  { %1373 = vmatpush.bf16.msra.mxu2 %v1734_v29 }
 0x557   :  { %v1163_v9 = vadd.f32 %v1134_v52, %v2541_v5  ;;  %v1164_v47 = vadd.f32 %v1147_v23, %v2542_v20  ;;  %v2545_v23 = vld [vmem:[#allocation21_spill] sm:$0xff] }
 0x559   :  { %v1646_v41 = vmul.f32 -1.442695, %v1163_v9  ;;  %v1647_v49 = vmul.f32 -1.442695, %v1164_v47  ;;  %v1732_v47 = vld [vmem:[%s2529_s6 + $0x10] sm:$0xff] }
 0x55b   :  { %1811 = vpow2.f32 %v1646_v41  ;;  %v1159_v58 = vpop.f32.mrf.mxu2 }
 0x55c   :  { %1813 = vpow2.f32 %v1647_v49  ;;  %v1135_v39 = vpop.f32.mrf.mxu0  ;;  %v1148_v19 = vpop.f32.mrf.mxu1  ;;  %v1160_v28 = vadd.f32 %v1159_v58, %v2302_v54 }
 0x55d   :  { %v1730_v19 = vld [vmem:[%s2529_s6] sm:$0xff] }
 0x561   :  { %v1812_v61 = vpop.eup %1811 }
 0x562   :  { %v1814_v0 = vpop.eup %1813  ;;  %v1171_v14 = vadd.f32 1.0, %v1812_v61 }
 0x563   :  { %v1172_v8 = vadd.f32 1.0, %v1814_v0  ;;  %v1161_v18 = vpop.f32.mrf.mxu2 }
 0x564   :  { %1815 = vrcp.f32 %v1171_v14  ;;  %v1184_v17 = vand.u32 2147483648, %v1171_v14  ;;  %v1182_v36 = vand.u32 2147483647, %v1171_v14  ;;  %vm1178_vm13 = vweird.f32 %v1171_v14 }
 0x565   :  { %1817 = vrcp.f32 %v1172_v8  ;;  %v1199_v25 = vand.u32 2147483648, %v1172_v8  ;;  %vm1193_vm1 = vweird.f32 %v1172_v8  ;;  %v1197_v34 = vand.u32 2147483647, %v1172_v8 }
 0x566   :  { %v1185_v31 = vor.u32 1.1754944e-38, %v1184_v17  ;;  %vm1183_vm15 = vcmp.eq.f32.partialorder %v1182_v36, 8.507059e+37 }
 0x567   :  { %v1200_v53 = vor.u32 1.1754944e-38, %v1199_v25  ;;  %vm1198_vm3 = vcmp.eq.f32.partialorder %v1197_v34, 8.507059e+37 }
 0x56a   :  { %v1816_v22 = vpop.eup %1815 }
 0x56b   :  { %v1818_v27 = vpop.eup %1817  ;;  %v1174_v42 = vmul.f32 %v1816_v22, %v1171_v14  ;;  %vm1179_vm12 = vweird.f32 %v1816_v22 }
 0x56c   :  { %v1189_v11 = vmul.f32 %v1818_v27, %v1172_v8  ;;  %vm1180_vm14 = vmor %vm1178_vm13, %vm1179_vm12  ;;  %vm1194_vm0 = vweird.f32 %v1818_v27 }
 0x56d   :  { %v1175_v45 = vsub.f32 1.0, %v1174_v42  ;;  %vm1195_vm2 = vmor %vm1193_vm1, %vm1194_vm0 }
 0x56e   :  { %v1190_v55 = vsub.f32 1.0, %v1189_v11 }
 0x56f   :  { %v1176_v57 = vmul.f32 %v1816_v22, %v1175_v45 }
 0x570   :  { %v1191_v48 = vmul.f32 %v1818_v27, %v1190_v55 }
 0x571   :  { %v1177_v60 = vadd.f32 %v1816_v22, %v1176_v57 }
 0x572   :  { %v1192_v37 = vadd.f32 %v1818_v27, %v1191_v48 }
 0x573   :  { %v1181_v10 = vsel %vm1180_vm14, %v1816_v22, %v1177_v60 }
 0x574   :  { %v1186_v33 = vsel %vm1183_vm15, %v1185_v31, %v1181_v10  ;;  %v1196_v50 = vsel %vm1195_vm2, %v1818_v27, %v1192_v37 }
 0x575   :  { %v1203_v40 = vmul.f32 %v1186_v33, %v1160_v28  ;;  %v1201_v63 = vsel %vm1198_vm3, %v1200_v53, %v1196_v50  ;;  %v385_v28 = vadd.f32 %v2338_v30, %v2243_v21  ;;  %v1750_v21 = vld [vmem:[%s2530_s7] ss:$0 sm:$0xff] }
 0x576   :  { %v1206_v38 = vsub.f32 1.0, %v1201_v63  ;;  %v1208_v2 = vmul.f32 %v1201_v63, %v1119_v62 }
 0x577   :  { %v1204_v46 = vadd.f32 %v1203_v40, %v2543_v43 }
 0x579   :  { %1819 = vtanh.f32 %v1204_v46 }
 0x57f   :  { %v1820_v4 = vpop.eup %1819 }
 0x580   :  { %v1207_v15 = vmul.f32 %v1820_v4, %v1206_v38 }
 0x582   :  { %v2477_v59 = vadd.f32 %v1208_v2, %v1207_v15 }
 0x584   :  { %v1213_v32 = vpack.c.bf16 %v2477_v59, %v2477_v59 }
 0x586   :  { %1222 = vmatmul.bf16.vlgmr.msra.gmra.mxu3 %v1213_v32  ;;  %1235 = vmatmul.bf16.vlgmr.msra.gmra.mxu0 %v1213_v32 }
 0x587   :  { %1248 = vmatmul.bf16.vlgmr.msra.gmra.mxu1 %v1213_v32 }
 0x603   :  { %v1236_v3 = vpop.f32.mrf.mxu0 }
 0x604   :  { %v1237_v12 = vadd.f32 %v1236_v3, %v2246_v24  ;;  %v1249_v51 = vpop.f32.mrf.mxu1  ;;  %v1733_v24 = vld [vmem:[%s2529_s6 + $0x18] sm:$0xff] }
 0x605   :  { %1374 = vmatpush.bf16.msra.mxu2 %v1733_v24  ;;  %v1250_v36 = vadd.f32 %v1249_v51, %v2302_v54 }
 0x606   :  { %v1254_v62 = vadd.f32 %v1237_v12, %v356_v7 }
 0x608   :  { %v1649_v1 = vmul.f32 -1.442695, %v1254_v62 }
 0x609   :  { %v1223_v44 = vpop.f32.mrf.mxu3  ;;  %1375 = vmatpush.bf16.msra.mxu2 %v1732_v47 }
 0x60a   :  { %1821 = vpow2.f32 %v1649_v1  ;;  %v1224_v52 = vadd.f32 %v1223_v44, %v2233_v13  ;;  %v1731_v13 = vld [vmem:[%s2529_s6 + $0x8] sm:$0xff]  ;;  %s1966_s6 = smov [#allocation10]  }
 0x60b   :  { %v1238_v26 = vpop.f32.mrf.mxu0  ;;  %s1400_s11 = sshll.u32 %s1966_s6, 4  ;;  %s1401_s11 = int_to_ptr.vmem [resolvable:$true] %s1400_s11 }
 0x60c   :  { %v1253_v5 = vadd.f32 %v1224_v52, %v2545_v23  ;;  %v1251_v9 = vpop.f32.mrf.mxu1 }
 0x60d   :  { %1376 = vmatpush.bf16.msra.mxu2 %v1731_v13 }
 0x60e   :  { %v1648_v20 = vmul.f32 -1.442695, %v1253_v5 }
 0x610   :  { %v1822_v41 = vpop.eup %1821  ;;  %1823 = vpow2.f32 %v1648_v20 }
 0x611   :  { %v1262_v49 = vadd.f32 1.0, %v1822_v41  ;;  %v1225_v58 = vpop.f32.mrf.mxu3  ;;  %1377 = vmatpush.bf16.msra.mxu2 %v1730_v19 }
 0x613   :  { %1825 = vrcp.f32 %v1262_v49  ;;  %v1289_v10 = vand.u32 2147483648, %v1262_v49  ;;  %vm1283_vm9 = vweird.f32 %v1262_v49  ;;  %v1287_v37 = vand.u32 2147483647, %v1262_v49 }
 0x615   :  { %v1290_v34 = vor.u32 1.1754944e-38, %v1289_v10  ;;  %vm1288_vm11 = vcmp.eq.f32.partialorder %v1287_v37, 8.507059e+37 }
 0x616   :  { %v1824_v39 = vpop.eup %1823 }
 0x617   :  { %v1261_v61 = vadd.f32 1.0, %v1824_v39 }
 0x619   :  { %1827 = vrcp.f32 %v1261_v61  ;;  %v1826_v0 = vpop.eup %1825  ;;  %v1274_v42 = vand.u32 2147483648, %v1261_v61  ;;  %v1272_v45 = vand.u32 2147483647, %v1261_v61  ;;  %vm1268_vm5 = vweird.f32 %v1261_v61 }
 0x61a   :  { %v1279_v14 = vmul.f32 %v1826_v0, %v1262_v49  ;;  %vm1284_vm8 = vweird.f32 %v1826_v0 }
 0x61b   :  { %v1275_v57 = vor.u32 1.1754944e-38, %v1274_v42  ;;  %vm1273_vm7 = vcmp.eq.f32.partialorder %v1272_v45, 8.507059e+37  ;;  %vm1285_vm10 = vmor %vm1283_vm9, %vm1284_vm8 }
 0x61c   :  { %v1280_v22 = vsub.f32 1.0, %v1279_v14 }
 0x61e   :  { %v1281_v55 = vmul.f32 %v1826_v0, %v1280_v22 }
 0x61f   :  { %v1828_v8 = vpop.eup %1827 }
 0x620   :  { %v1264_v18 = vmul.f32 %v1828_v8, %v1261_v61  ;;  %vm1269_vm4 = vweird.f32 %v1828_v8  ;;  %v1282_v31 = vadd.f32 %v1826_v0, %v1281_v55 }
 0x621   :  { %vm1270_vm6 = vmor %vm1268_vm5, %vm1269_vm4 }
 0x622   :  { %v1265_v27 = vsub.f32 1.0, %v1264_v18  ;;  %v1286_v25 = vsel %vm1285_vm10, %v1826_v0, %v1282_v31 }
 0x623   :  { %v1291_v43 = vsel %vm1288_vm11, %v1290_v34, %v1286_v25 }
 0x624   :  { %v1266_v11 = vmul.f32 %v1828_v8, %v1265_v27  ;;  %v1296_v54 = vsub.f32 1.0, %v1291_v43  ;;  %v1298_v53 = vmul.f32 %v1291_v43, %v2477_v59 }
 0x626   :  { %v1267_v17 = vadd.f32 %v1828_v8, %v1266_v11 }
 0x628   :  { %v1271_v48 = vsel %vm1270_vm6, %v1828_v8, %v1267_v17 }
 0x629   :  { %v1276_v60 = vsel %vm1273_vm7, %v1275_v57, %v1271_v48 }
 0x62a   :  { %v1293_v33 = vmul.f32 %v1276_v60, %v1250_v36 }
 0x62c   :  { %v1294_v40 = vadd.f32 %v1293_v33, %v385_v28 }
 0x62e   :  { %1829 = vtanh.f32 %v1294_v40 }
 0x634   :  { %v1830_v46 = vpop.eup %1829 }
 0x635   :  { %v1297_v50 = vmul.f32 %v1830_v46, %v1296_v54 }
 0x637   :  { %v1299_v63 = vadd.f32 %v1298_v53, %v1297_v50 }
 0x639   :  { %v1301_v38 = vpack.c.bf16 %v1299_v63, %v1299_v63  ;;  %1300 = vst [vmem:[#allocation10] sm:$0xff] %v1299_v63 }
 0x63a   :  { %1405 = dma.vmem_to_hbm [thread:$0]  %s1401_s11, 128, %s1403_s14, [#allocation11]  }
 0x63b   :  { %1378 = vmatmul.bf16.vlgmr.msra.gmra.mxu2 %v1301_v38 }
 0x6be   :  { %v1379_v30 = vpop.f32.mrf.mxu2 }
 0x6bf   :  { %v1380_v4 = vadd.f32 %v1750_v21, %v1379_v30 }
 0x6c1   :  { %1383 = vst [vmem:[#allocation9] sm:$0xff] %v1380_v4 }
 0x6c2   :  { %1394 = dma.vmem_to_hbm [thread:$0]  %s1390_s0, 128, %s1392_s20, [#allocation5]  }
 0x6c6   :  { %v1381_v15 = vpop.f32.mrf.mxu2 }
 0x6c7   :  { %1955 = dma.done.wait [#allocation5], 128  }
 0x6c8   :  { %1956 = vsyncadd [#allocation5], 4294967168 }
 0x6c9   :  { %1957 = dma.done.wait [#allocation11], 128  }
 0x6ca   :  { %1958 = vsyncadd [#allocation11], 4294967168 }
 0x6cb   :  { %1414 = vsyncpa [#allocation4], 1 }
 0x6cc   :  { %1415 = vsyncpa [#allocation7], 1 }
 0x6cd   :  { %1416 = vsyncpa [#allocation5], 1 }
 0x6ce   :  { %1417 = vsyncpa [#allocation11], 1 }

</bundles_post_ra>
